<compile_context>
chip_gen: v7x
topology: tpu7x:2x2x1
jax: 0.10.0
libtpu: 0.0.40
codegen_flags: <defaults>
</compile_context>

<pallas_src>
import functools

import numpy as np
import jax
import jax.numpy as jnp
from jax.experimental import pallas as pl
from jax.experimental.pallas import tpu as pltpu

# ----------------------------------------------------------------------------
# Synthetic "config" (small shapes, same formulas as ResNetHead.__init__)
# ----------------------------------------------------------------------------
POOLER_RESOLUTION = 8          # config.MODEL.ROI_BOX_HEAD.POOLER_RESOLUTION
POOLER_SCALE = 0.25            # single-scale pooler
SAMPLING_RATIO = 2
RES2_OUT_CHANNELS = 4          # real model: 256 (kept tiny here)
NUM_GROUPS = 1
WIDTH_PER_GROUP = 1            # real model: 64 (kept tiny here)
STAGE_INDEX = 4
BLOCK_COUNT = 3
STRIDE_IN_1X1 = True
DILATION = 1

_STAGE2_REL = 2 ** (STAGE_INDEX - 1)                               # 8
OUT_CHANNELS = RES2_OUT_CHANNELS * _STAGE2_REL                     # 32
IN_CHANNELS = OUT_CHANNELS // 2                                    # 16
BOTTLENECK_CHANNELS = NUM_GROUPS * WIDTH_PER_GROUP * _STAGE2_REL   # 8

ROI_TILE = 2                        # ROIs processed per bottleneck grid step
VMEM_LIMIT = 32 * 1024 * 1024       # explicit scoped-VMEM ceiling (safe on v5e..v7x)


# ----------------------------------------------------------------------------
# Separable ROIAlign (aligned=False semantics, matching maskrcnn_benchmark)
# ----------------------------------------------------------------------------
def _bilinear_1d_matrix(c1, c2, size, P, g):
    """Per-ROI (P, size) 1-D bilinear-average matrix for one spatial axis."""
    roi = jnp.maximum(c2 - c1, 1.0)
    bin_ = roi / P
    p = jnp.arange(P, dtype=jnp.float32)
    s = jnp.arange(g, dtype=jnp.float32)
    coord = (c1[:, None, None]
             + p[None, :, None] * bin_[:, None, None]
             + (s[None, None, :] + 0.5) * bin_[:, None, None] / g)   # (R, P, g)
    valid = (coord >= -1.0) & (coord <= size)
    coord = jnp.clip(coord, 0.0, None)
    low = jnp.minimum(jnp.floor(coord).astype(jnp.int32), size - 1)
    high = jnp.minimum(low + 1, size - 1)
    coord = jnp.where(low >= size - 1, jnp.float32(size - 1), coord)
    lw = coord - low.astype(jnp.float32)
    hw = 1.0 - lw
    wgt = jnp.where(valid, 1.0 / g, 0.0)
    oh_low = jax.nn.one_hot(low, size, dtype=jnp.float32)
    oh_high = jax.nn.one_hot(high, size, dtype=jnp.float32)
    return jnp.sum(wgt[..., None] * (hw[..., None] * oh_low
                                     + lw[..., None] * oh_high), axis=2)  # (R,P,size)


def _roi_align_y_kernel(idx_ref, ay_ref, f_ref, o_ref):
    # ay: (1, P, H), f: (1, H, W*C)  ->  o: (1, P, W*C)
    del idx_ref  # only used by the index_maps (scalar prefetch)
    o_ref[0] = jnp.dot(ay_ref[0], f_ref[0],
                       preferred_element_type=jnp.float32).astype(o_ref.dtype)


def _roi_align_x_kernel(ax_ref, t_ref, o_ref, *, P):
    # ax: (1, P, W), t: (1, P, W, C)  ->  o: (1, P, P, C)
    ax = ax_ref[0]
    for p in range(P):
        o_ref[0, p] = jnp.dot(ax, t_ref[0, p],
                              preferred_element_type=jnp.float32).astype(o_ref.dtype)


def roi_align(feats_nhwc, rois, img_idx, P, sampling_ratio, scale):
    """feats (N,H,W,C) bf16, ROIs sorted by img_idx.  Returns (R*P*P, C) bf16."""
    N, H, W, C = feats_nhwc.shape
    R = rois.shape[0]
    Ay = _bilinear_1d_matrix(rois[:, 1] * scale, rois[:, 3] * scale, H, P,
                             sampling_ratio).astype(jnp.bfloat16)
    Ax = _bilinear_1d_matrix(rois[:, 0] * scale, rois[:, 2] * scale, W, P,
                             sampling_ratio).astype(jnp.bfloat16)
    feats2d = feats_nhwc.reshape(N, H, W * C)

    # Pass 1: contract the y axis.  The feature block index depends only on the
    # ROI's image id (scalar prefetch); with ROIs grouped by image the per-image
    # feature map is fetched once, not once per ROI.
    t1 = pl.pallas_call(
        _roi_align_y_kernel,
        out_shape=jax.ShapeDtypeStruct((R, P, W * C), jnp.bfloat16),
        grid_spec=pltpu.PrefetchScalarGridSpec(
            num_scalar_prefetch=1,
            grid=(R,),
            in_specs=[
                pl.BlockSpec((1, P, H), lambda r, idx: (r, 0, 0)),
                pl.BlockSpec((1, H, W * C), lambda r, idx: (idx[r], 0, 0)),
            ],
            out_specs=pl.BlockSpec((1, P, W * C), lambda r, idx: (r, 0, 0)),
        ),
        compiler_params=pltpu.CompilerParams(
            dimension_semantics=("parallel",),
            vmem_limit_bytes=VMEM_LIMIT),
    )(img_idx, Ay, feats2d)

    # Pass 2: contract the x axis (the reshape below is a free row-major bitcast).
    t1 = t1.reshape(R, P, W, C)
    pooled = pl.pallas_call(
        functools.partial(_roi_align_x_kernel, P=P),
        out_shape=jax.ShapeDtypeStruct((R, P, P, C), jnp.bfloat16),
        grid=(R,),
        in_specs=[
            pl.BlockSpec((1, P, W), lambda r: (r, 0, 0)),
            pl.BlockSpec((1, P, W, C), lambda r: (r, 0, 0, 0)),
        ],
        out_specs=pl.BlockSpec((1, P, P, C), lambda r: (r, 0, 0, 0)),
        compiler_params=pltpu.CompilerParams(
            dimension_semantics=("parallel",),
            vmem_limit_bytes=VMEM_LIMIT),
    )(Ax, t1)
    # ROI-major (rows, channels) slab for the head.
    return pooled.reshape(R * P * P, C)


# ----------------------------------------------------------------------------
# Fused bottleneck block (conv1 1x1 -> conv2 3x3 -> conv3 1x1 + residual)
# ----------------------------------------------------------------------------
def _stride_select_matrix(h_in, stride):
    """(M_out, M_in) 0/1 matrix selecting the stride-s grid of a flattened map."""
    h_out = (h_in - 1) // stride + 1
    S = np.zeros((h_out * h_out, h_in * h_in), np.float32)
    for i in range(h_out):
        for j in range(h_out):
            S[i * h_out + j, (i * stride) * h_in + (j * stride)] = 1.0
    return jnp.asarray(S, dtype=jnp.bfloat16)


def _conv3x3_tap_masks(hs, dil, roi_tile):
    """(9, roi_tile*hs*hs, 1) f32 validity masks for the 9 shifted-matmul taps."""
    m = np.zeros((9, hs * hs), np.float32)
    t = 0
    for dy in (-1, 0, 1):
        for dx in (-1, 0, 1):
            for i in range(hs):
                for j in range(hs):
                    ii, jj = i + dy * dil, j + dx * dil
                    if 0 <= ii < hs and 0 <= jj < hs:
                        m[t, i * hs + j] = 1.0
            t += 1
    m = np.tile(m, (1, roi_tile))
    return jnp.asarray(m[:, :, None])


def _bottleneck_kernel(*refs, stride, downsample, roi_tile, m_in, m_out, w_out, dil):
    if downsample:
        (x_ref, s_ref, msk_ref, w1_ref, b1_ref, w2_ref, b2_ref,
         w3_ref, b3_ref, wd_ref, bd_ref, o_ref) = refs
    else:
        (x_ref, msk_ref, w1_ref, b1_ref, w2_ref, b2_ref,
         w3_ref, b3_ref, o_ref) = refs

    rows_out = roi_tile * m_out

    # stride_in_1x1: fold the stride-2 subsample into the kernel as a 0/1
    # row-selection matmul (per ROI) -- no extra XLA/HBM pass for the slice.
    if stride > 1:
        sel = s_ref[...]
        xs = jnp.concatenate(
            [jnp.dot(sel, x_ref[pl.ds(t * m_in, m_in), :],
                     preferred_element_type=jnp.float32)
             for t in range(roi_tile)],
            axis=0).astype(jnp.bfloat16)                      # (rows_out, Cin)
        x_full = None
    else:
        x_full = x_ref[...]
        xs = x_full

    # conv1 (1x1, FrozenBN folded into W/b) + ReLU
    a1 = jnp.dot(xs, w1_ref[...], preferred_element_type=jnp.float32) + b1_ref[...]
    a1 = jnp.maximum(a1, 0.0).astype(jnp.bfloat16)            # (rows_out, Cb)

    # conv2 (3x3, pad=dil): 9 shifted matmuls accumulated in f32 -- the im2col
    # tensor never exists; boundary/cross-ROI rows are zeroed by per-tap masks.
    cb = a1.shape[-1]
    off0 = dil * (w_out + 1)
    zpad = jnp.zeros((off0, cb), jnp.bfloat16)
    a1p = jnp.concatenate([zpad, a1, zpad], axis=0)
    acc = jnp.zeros((rows_out, cb), jnp.float32)
    tap = 0
    for dy in (-1, 0, 1):
        for dx in (-1, 0, 1):
            start = off0 + dil * (dy * w_out + dx)
            patch = a1p[start:start + rows_out]
            acc = acc + jnp.dot(patch, w2_ref[tap],
                                preferred_element_type=jnp.float32) * msk_ref[tap]
            tap += 1
    a2 = jnp.maximum(acc + b2_ref[...], 0.0).astype(jnp.bfloat16)

    # conv3 (1x1) + residual (downsample 1x1 on the strided input for block 0)
    a3 = jnp.dot(a2, w3_ref[...], preferred_element_type=jnp.float32) + b3_ref[...]
    if downsample:
        idn = jnp.dot(xs, wd_ref[...], preferred_element_type=jnp.float32) + bd_ref[...]
    else:
        idn = x_full.astype(jnp.float32)
    o_ref[...] = jnp.maximum(a3 + idn, 0.0).astype(o_ref.dtype)


def bottleneck_block(x2d, p, *, stride, downsample, h_in, roi_tile, n_roi_pad):
    cin = x2d.shape[-1]
    cb = p['w1'].shape[-1]
    cout = p['w3'].shape[-1]
    h_out = (h_in - 1) // stride + 1
    m_in, m_out = h_in * h_in, h_out * h_out
    rows_in_blk = roi_tile * m_in
    rows_out_blk = roi_tile * m_out

    masks = _conv3x3_tap_masks(h_out, DILATION, roi_tile)

    in_specs = [pl.BlockSpec((rows_in_blk, cin), lambda i: (i, 0))]
    args = [x2d]
    if downsample:
        sel = _stride_select_matrix(h_in, stride)
        in_specs.append(pl.BlockSpec((m_out, m_in), lambda i: (0, 0)))
        args.append(sel)
    in_specs += [
        pl.BlockSpec((9, rows_out_blk, 1), lambda i: (0, 0, 0)),
        pl.BlockSpec((cin, cb), lambda i: (0, 0)),
        pl.BlockSpec((1, cb), lambda i: (0, 0)),
        pl.BlockSpec((9, cb, cb), lambda i: (0, 0, 0)),
        pl.BlockSpec((1, cb), lambda i: (0, 0)),
        pl.BlockSpec((cb, cout), lambda i: (0, 0)),
        pl.BlockSpec((1, cout), lambda i: (0, 0)),
    ]
    args += [masks, p['w1'], p['b1'], p['w2'], p['b2'], p['w3'], p['b3']]
    if downsample:
        in_specs += [
            pl.BlockSpec((cin, cout), lambda i: (0, 0)),
            pl.BlockSpec((1, cout), lambda i: (0, 0)),
        ]
        args += [p['wd'], p['bd']]

    kernel = functools.partial(
        _bottleneck_kernel, stride=stride, downsample=downsample,
        roi_tile=roi_tile, m_in=m_in, m_out=m_out, w_out=h_out, dil=DILATION)

    return pl.pallas_call(
        kernel,
        out_shape=jax.ShapeDtypeStruct((n_roi_pad * m_out, cout), jnp.bfloat16),
        grid=(n_roi_pad // roi_tile,),
        in_specs=in_specs,
        out_specs=pl.BlockSpec((rows_out_blk, cout), lambda i: (i, 0)),
        compiler_params=pltpu.CompilerParams(
            dimension_semantics=("parallel",),
            vmem_limit_bytes=VMEM_LIMIT),
    )(*args)


# ----------------------------------------------------------------------------
# Parameters: conv weights in GEMM layout, FrozenBN folded into weight/bias.
# ----------------------------------------------------------------------------
def _frozen_bn_scale_bias(key, c):
    kw, kb, km, kv = jax.random.split(key, 4)
    weight = jax.random.uniform(kw, (c,), minval=0.5, maxval=1.5)
    bias = 0.1 * jax.random.normal(kb, (c,))
    running_mean = 0.1 * jax.random.normal(km, (c,))
    running_var = jax.random.uniform(kv, (c,), minval=0.5, maxval=1.5)
    scale = weight / jnp.sqrt(running_var)          # FrozenBatchNorm2d affine
    shift = bias - running_mean * scale
    return scale.astype(jnp.float32), shift.astype(jnp.float32)


def _conv_w(key, k_in, c_out):
    return (0.1 * jax.random.normal(key, (k_in, c_out))).astype(jnp.float32)


def init_head_params(key):
    params = []
    in_c = IN_CHANNELS
    for blk in range(BLOCK_COUNT):
        keys = jax.random.split(jax.random.fold_in(key, blk), 8)
        s1, sh1 = _frozen_bn_scale_bias(keys[1], BOTTLENECK_CHANNELS)
        s2, sh2 = _frozen_bn_scale_bias(keys[3], BOTTLENECK_CHANNELS)
        s3, sh3 = _frozen_bn_scale_bias(keys[5], OUT_CHANNELS)
        w1 = _conv_w(keys[0], in_c, BOTTLENECK_CHANNELS) * s1[None, :]
        w2 = (0.1 * jax.random.normal(
            keys[2], (9, BOTTLENECK_CHANNELS, BOTTLENECK_CHANNELS))) * s2[None, None, :]
        w3 = _conv_w(keys[4], BOTTLENECK_CHANNELS, OUT_CHANNELS) * s3[None, :]
        p = {
            'w1': w1.astype(jnp.bfloat16), 'b1': sh1.reshape(1, -1),
            'w2': w2.astype(jnp.bfloat16), 'b2': sh2.reshape(1, -1),
            'w3': w3.astype(jnp.bfloat16), 'b3': sh3.reshape(1, -1),
        }
        if blk == 0:
            sd, shd = _frozen_bn_scale_bias(keys[7], OUT_CHANNELS)
            wd = _conv_w(keys[6], in_c, OUT_CHANNELS) * sd[None, :]
            p['wd'] = wd.astype(jnp.bfloat16)
            p['bd'] = shd.reshape(1, -1)
        params.append(p)
        in_c = OUT_CHANNELS
    return params


# ----------------------------------------------------------------------------
# Public forward: x = pooler(features, proposals); x = head(x)
# ----------------------------------------------------------------------------
@jax.jit
def roi_box_feature_extractor(features_nchw, rois, img_idx, params):
    R = rois.shape[0]
    P = POOLER_RESOLUTION

    feats = jnp.transpose(features_nchw, (0, 2, 3, 1)).astype(jnp.bfloat16)  # NHWC

    # Group ROIs by image so the pooler's feature block is fetched once/image.
    order = jnp.argsort(img_idx)
    inv_order = jnp.argsort(order)
    rois_s = rois[order].astype(jnp.float32)
    idx_s = img_idx[order].astype(jnp.int32)

    x2d = roi_align(feats, rois_s, idx_s, P, SAMPLING_RATIO, POOLER_SCALE)

    # Pad ROI count to a multiple of the ROI tile (padded rows are sliced away).
    n_roi_pad = ((R + ROI_TILE - 1) // ROI_TILE) * ROI_TILE
    if n_roi_pad != R:
        x2d = jnp.pad(x2d, ((0, (n_roi_pad - R) * P * P), (0, 0)))

    h = P
    for blk, p in enumerate(params):
        stride = 2 if blk == 0 else 1
        x2d = bottleneck_block(x2d, p, stride=stride, downsample=(blk == 0),
                               h_in=h, roi_tile=ROI_TILE, n_roi_pad=n_roi_pad)
        h = (h - 1) // stride + 1

    out = x2d[:R * h * h].reshape(R, h, h, OUT_CHANNELS)
    out = jnp.take(out, inv_order, axis=0)                       # undo ROI sort
    return jnp.transpose(out, (0, 3, 1, 2)).astype(jnp.float32)  # NCHW


if __name__ == "__main__":
    key = jax.random.PRNGKey(0)
    kf, kb1, kb2, kp = jax.random.split(key, 4)

    # Feature map (single level), NCHW: (num_images, IN_CHANNELS, 16, 16)
    N, H, W = 2, 16, 16
    features = jax.random.normal(kf, (N, IN_CHANNELS, H, W), dtype=jnp.float32)

    # Proposals in image coordinates (image is 64x64 at scale 0.25), 4 ROIs.
    R = 4
    xy1 = jax.random.uniform(kb1, (R, 2), minval=0.0, maxval=40.0)
    wh = jax.random.uniform(kb2, (R, 2), minval=8.0, maxval=24.0)
    rois = jnp.concatenate([xy1, xy1 + wh], axis=-1)          # (R, 4) x1,y1,x2,y2
    img_idx = jnp.array([0, 1, 0, 1], dtype=jnp.int32)        # ROI -> image index

    params = init_head_params(kp)
    out = roi_box_feature_extractor(features, rois, img_idx, params)
    out = jax.block_until_ready(out)
    assert out.shape == (R, OUT_CHANNELS,
                         POOLER_RESOLUTION // 2, POOLER_RESOLUTION // 2), out.shape
    assert bool(jnp.all(jnp.isfinite(out)))
    print("KERNEL_OK")
</pallas_src>

<mosaic_0001>
module attributes {stable_mosaic.version = 11 : i64} {
  func.func @_roi_align_y_kernel(%arg0: i32, %arg1: memref<4xi32, #tpu.memory_space<smem>>, %arg2: memref<1x8x16xbf16, #tpu.memory_space<vmem>>, %arg3: memref<1x16x256xbf16, #tpu.memory_space<vmem>>, %arg4: memref<1x8x256xbf16, #tpu.memory_space<vmem>>) attributes {dimension_semantics = [#tpu.dimension_semantics<parallel>], iteration_bounds = array<i64: 4>, scalar_prefetch = 1 : i64, scratch_operands = 0 : i64, tpu.core_type = #tpu.core_type<tc>, window_params = [{transform_indices = @transform_0, window_bounds = array<i64: 1, 8, 16>}, {transform_indices = @transform_1, window_bounds = array<i64: 1, 16, 256>}, {transform_indices = @transform_2, window_bounds = array<i64: 1, 8, 256>}]} {
    %c0 = arith.constant 0 : index
    %c0_0 = arith.constant 0 : index
    %c0_1 = arith.constant 0 : index
    %0 = vector.load %arg2[%c0, %c0_0, %c0_1] : memref<1x8x16xbf16, #tpu.memory_space<vmem>>, vector<1x8x16xbf16>
    %1 = vector.shape_cast %0 : vector<1x8x16xbf16> to vector<8x16xbf16>
    %c0_2 = arith.constant 0 : index
    %c0_3 = arith.constant 0 : index
    %c0_4 = arith.constant 0 : index
    %2 = vector.load %arg3[%c0_2, %c0_3, %c0_4] : memref<1x16x256xbf16, #tpu.memory_space<vmem>>, vector<1x16x256xbf16>
    %3 = vector.shape_cast %2 : vector<1x16x256xbf16> to vector<16x256xbf16>
    %cst = arith.constant dense<0.000000e+00> : vector<8x256xf32>
    %4 = tpu.matmul %1, %3, %cst {dimension_numbers = #tpu.dot_dimension_numbers<[1], [0], [0], [1], [0, 0, 1, 1], [], []>} : vector<8x16xbf16>, vector<16x256xbf16>, vector<8x256xf32> -> vector<8x256xf32>
    %5 = arith.truncf %4 : vector<8x256xf32> to vector<8x256xbf16>
    %c0_5 = arith.constant 0 : index
    %c0_6 = arith.constant 0 : index
    %c0_7 = arith.constant 0 : index
    %6 = vector.load %arg4[%c0_5, %c0_6, %c0_7] : memref<1x8x256xbf16, #tpu.memory_space<vmem>>, vector<1x8x256xbf16>
    %7 = vector.shape_cast %6 : vector<1x8x256xbf16> to vector<8x256xbf16>
    %8 = vector.shape_cast %5 : vector<8x256xbf16> to vector<1x8x256xbf16>
    tpu.vector_store %arg4[%c0_5, %c0_6, %c0_7], %8 {strides = array<i32>} : memref<1x8x256xbf16, #tpu.memory_space<vmem>>, vector<1x8x256xbf16>,
    return
  }
  func.func @transform_0(%arg0: i32, %arg1: memref<4xi32, #tpu.memory_space<smem>>) -> (i32, i32, i32) {
    %c0_i32 = arith.constant 0 : i32
    %c0_i32_0 = arith.constant 0 : i32
    %c0_i32_1 = arith.constant 0 : i32
    return %arg0, %c0_i32, %c0_i32_0 : i32, i32, i32
  }
  func.func @transform_1(%arg0: i32, %arg1: memref<4xi32, #tpu.memory_space<smem>>) -> (i32, i32, i32) {
    %0 = arith.index_cast %arg0 : i32 to index
    %1 = memref.load %arg1[%0] : memref<4xi32, #tpu.memory_space<smem>>
    %c0_i32 = arith.constant 0 : i32
    %c0_i32_0 = arith.constant 0 : i32
    %c0_i32_1 = arith.constant 0 : i32
    return %1, %c0_i32, %c0_i32_0 : i32, i32, i32
  }
  func.func @transform_2(%arg0: i32, %arg1: memref<4xi32, #tpu.memory_space<smem>>) -> (i32, i32, i32) {
    %c0_i32 = arith.constant 0 : i32
    %c0_i32_0 = arith.constant 0 : i32
    %c0_i32_1 = arith.constant 0 : i32
    return %arg0, %c0_i32, %c0_i32_0 : i32, i32, i32
  }
}

module attributes {stable_mosaic.version = 11 : i64} {
  func.func @_roi_align_x_kernel(%arg0: i32, %arg1: memref<1x8x16xbf16, #tpu.memory_space<vmem>>, %arg2: memref<1x8x16x16xbf16, #tpu.memory_space<vmem>>, %arg3: memref<1x8x8x16xbf16, #tpu.memory_space<vmem>>) attributes {dimension_semantics = [#tpu.dimension_semantics<parallel>], iteration_bounds = array<i64: 4>, scalar_prefetch = 0 : i64, scratch_operands = 0 : i64, tpu.core_type = #tpu.core_type<tc>, window_params = [{transform_indices = @transform_0, window_bounds = array<i64: 1, 8, 16>}, {transform_indices = @transform_1, window_bounds = array<i64: 1, 8, 16, 16>}, {transform_indices = @transform_2, window_bounds = array<i64: 1, 8, 8, 16>}]} {
    %c0 = arith.constant 0 : index
    %c0_0 = arith.constant 0 : index
    %c0_1 = arith.constant 0 : index
    %0 = vector.load %arg1[%c0, %c0_0, %c0_1] : memref<1x8x16xbf16, #tpu.memory_space<vmem>>, vector<1x8x16xbf16>
    %1 = vector.shape_cast %0 : vector<1x8x16xbf16> to vector<8x16xbf16>
    %c0_2 = arith.constant 0 : index
    %c0_3 = arith.constant 0 : index
    %c0_4 = arith.constant 0 : index
    %c0_5 = arith.constant 0 : index
    %2 = vector.load %arg2[%c0_2, %c0_3, %c0_4, %c0_5] : memref<1x8x16x16xbf16, #tpu.memory_space<vmem>>, vector<1x1x16x16xbf16>
    %3 = vector.shape_cast %2 : vector<1x1x16x16xbf16> to vector<16x16xbf16>
    %cst = arith.constant dense<0.000000e+00> : vector<8x16xf32>
    %4 = tpu.matmul %1, %3, %cst {dimension_numbers = #tpu.dot_dimension_numbers<[1], [0], [0], [1], [0, 0, 1, 1], [], []>} : vector<8x16xbf16>, vector<16x16xbf16>, vector<8x16xf32> -> vector<8x16xf32>
    %5 = arith.truncf %4 : vector<8x16xf32> to vector<8x16xbf16>
    %c0_6 = arith.constant 0 : index
    %c0_7 = arith.constant 0 : index
    %c0_8 = arith.constant 0 : index
    %c0_9 = arith.constant 0 : index
    %6 = vector.load %arg3[%c0_6, %c0_7, %c0_8, %c0_9] : memref<1x8x8x16xbf16, #tpu.memory_space<vmem>>, vector<1x1x8x16xbf16>
    %7 = vector.shape_cast %6 : vector<1x1x8x16xbf16> to vector<8x16xbf16>
    %8 = vector.shape_cast %5 : vector<8x16xbf16> to vector<1x1x8x16xbf16>
    tpu.vector_store %arg3[%c0_6, %c0_7, %c0_8, %c0_9], %8 {strides = array<i32>} : memref<1x8x8x16xbf16, #tpu.memory_space<vmem>>, vector<1x1x8x16xbf16>,
    %c0_10 = arith.constant 0 : index
    %c1 = arith.constant 1 : index
    %c0_11 = arith.constant 0 : index
    %c0_12 = arith.constant 0 : index
    %9 = vector.load %arg2[%c0_10, %c1, %c0_11, %c0_12] : memref<1x8x16x16xbf16, #tpu.memory_space<vmem>>, vector<1x1x16x16xbf16>
    %10 = vector.shape_cast %9 : vector<1x1x16x16xbf16> to vector<16x16xbf16>
    %cst_13 = arith.constant dense<0.000000e+00> : vector<8x16xf32>
    %11 = tpu.matmul %1, %10, %cst_13 {dimension_numbers = #tpu.dot_dimension_numbers<[1], [0], [0], [1], [0, 0, 1, 1], [], []>} : vector<8x16xbf16>, vector<16x16xbf16>, vector<8x16xf32> -> vector<8x16xf32>
    %12 = arith.truncf %11 : vector<8x16xf32> to vector<8x16xbf16>
    %c0_14 = arith.constant 0 : index
    %c1_15 = arith.constant 1 : index
    %c0_16 = arith.constant 0 : index
    %c0_17 = arith.constant 0 : index
    %13 = vector.load %arg3[%c0_14, %c1_15, %c0_16, %c0_17] : memref<1x8x8x16xbf16, #tpu.memory_space<vmem>>, vector<1x1x8x16xbf16>
    %14 = vector.shape_cast %13 : vector<1x1x8x16xbf16> to vector<8x16xbf16>
    %15 = vector.shape_cast %12 : vector<8x16xbf16> to vector<1x1x8x16xbf16>
    tpu.vector_store %arg3[%c0_14, %c1_15, %c0_16, %c0_17], %15 {strides = array<i32>} : memref<1x8x8x16xbf16, #tpu.memory_space<vmem>>, vector<1x1x8x16xbf16>,
    %c0_18 = arith.constant 0 : index
    %c2 = arith.constant 2 : index
    %c0_19 = arith.constant 0 : index
    %c0_20 = arith.constant 0 : index
    %16 = vector.load %arg2[%c0_18, %c2, %c0_19, %c0_20] : memref<1x8x16x16xbf16, #tpu.memory_space<vmem>>, vector<1x1x16x16xbf16>
    %17 = vector.shape_cast %16 : vector<1x1x16x16xbf16> to vector<16x16xbf16>
    %cst_21 = arith.constant dense<0.000000e+00> : vector<8x16xf32>
    %18 = tpu.matmul %1, %17, %cst_21 {dimension_numbers = #tpu.dot_dimension_numbers<[1], [0], [0], [1], [0, 0, 1, 1], [], []>} : vector<8x16xbf16>, vector<16x16xbf16>, vector<8x16xf32> -> vector<8x16xf32>
    %19 = arith.truncf %18 : vector<8x16xf32> to vector<8x16xbf16>
    %c0_22 = arith.constant 0 : index
    %c2_23 = arith.constant 2 : index
    %c0_24 = arith.constant 0 : index
    %c0_25 = arith.constant 0 : index
    %20 = vector.load %arg3[%c0_22, %c2_23, %c0_24, %c0_25] : memref<1x8x8x16xbf16, #tpu.memory_space<vmem>>, vector<1x1x8x16xbf16>
    %21 = vector.shape_cast %20 : vector<1x1x8x16xbf16> to vector<8x16xbf16>
    %22 = vector.shape_cast %19 : vector<8x16xbf16> to vector<1x1x8x16xbf16>
    tpu.vector_store %arg3[%c0_22, %c2_23, %c0_24, %c0_25], %22 {strides = array<i32>} : memref<1x8x8x16xbf16, #tpu.memory_space<vmem>>, vector<1x1x8x16xbf16>,
    %c0_26 = arith.constant 0 : index
    %c3 = arith.constant 3 : index
    %c0_27 = arith.constant 0 : index
    %c0_28 = arith.constant 0 : index
    %23 = vector.load %arg2[%c0_26, %c3, %c0_27, %c0_28] : memref<1x8x16x16xbf16, #tpu.memory_space<vmem>>, vector<1x1x16x16xbf16>
    %24 = vector.shape_cast %23 : vector<1x1x16x16xbf16> to vector<16x16xbf16>
    %cst_29 = arith.constant dense<0.000000e+00> : vector<8x16xf32>
    %25 = tpu.matmul %1, %24, %cst_29 {dimension_numbers = #tpu.dot_dimension_numbers<[1], [0], [0], [1], [0, 0, 1, 1], [], []>} : vector<8x16xbf16>, vector<16x16xbf16>, vector<8x16xf32> -> vector<8x16xf32>
    %26 = arith.truncf %25 : vector<8x16xf32> to vector<8x16xbf16>
    %c0_30 = arith.constant 0 : index
    %c3_31 = arith.constant 3 : index
    %c0_32 = arith.constant 0 : index
    %c0_33 = arith.constant 0 : index
    %27 = vector.load %arg3[%c0_30, %c3_31, %c0_32, %c0_33] : memref<1x8x8x16xbf16, #tpu.memory_space<vmem>>, vector<1x1x8x16xbf16>
    %28 = vector.shape_cast %27 : vector<1x1x8x16xbf16> to vector<8x16xbf16>
    %29 = vector.shape_cast %26 : vector<8x16xbf16> to vector<1x1x8x16xbf16>
    tpu.vector_store %arg3[%c0_30, %c3_31, %c0_32, %c0_33], %29 {strides = array<i32>} : memref<1x8x8x16xbf16, #tpu.memory_space<vmem>>, vector<1x1x8x16xbf16>,
    %c0_34 = arith.constant 0 : index
    %c4 = arith.constant 4 : index
    %c0_35 = arith.constant 0 : index
    %c0_36 = arith.constant 0 : index
    %30 = vector.load %arg2[%c0_34, %c4, %c0_35, %c0_36] : memref<1x8x16x16xbf16, #tpu.memory_space<vmem>>, vector<1x1x16x16xbf16>
    %31 = vector.shape_cast %30 : vector<1x1x16x16xbf16> to vector<16x16xbf16>
    %cst_37 = arith.constant dense<0.000000e+00> : vector<8x16xf32>
    %32 = tpu.matmul %1, %31, %cst_37 {dimension_numbers = #tpu.dot_dimension_numbers<[1], [0], [0], [1], [0, 0, 1, 1], [], []>} : vector<8x16xbf16>, vector<16x16xbf16>, vector<8x16xf32> -> vector<8x16xf32>
    %33 = arith.truncf %32 : vector<8x16xf32> to vector<8x16xbf16>
    %c0_38 = arith.constant 0 : index
    %c4_39 = arith.constant 4 : index
    %c0_40 = arith.constant 0 : index
    %c0_41 = arith.constant 0 : index
    %34 = vector.load %arg3[%c0_38, %c4_39, %c0_40, %c0_41] : memref<1x8x8x16xbf16, #tpu.memory_space<vmem>>, vector<1x1x8x16xbf16>
    %35 = vector.shape_cast %34 : vector<1x1x8x16xbf16> to vector<8x16xbf16>
    %36 = vector.shape_cast %33 : vector<8x16xbf16> to vector<1x1x8x16xbf16>
    tpu.vector_store %arg3[%c0_38, %c4_39, %c0_40, %c0_41], %36 {strides = array<i32>} : memref<1x8x8x16xbf16, #tpu.memory_space<vmem>>, vector<1x1x8x16xbf16>,
    %c0_42 = arith.constant 0 : index
    %c5 = arith.constant 5 : index
    %c0_43 = arith.constant 0 : index
    %c0_44 = arith.constant 0 : index
    %37 = vector.load %arg2[%c0_42, %c5, %c0_43, %c0_44] : memref<1x8x16x16xbf16, #tpu.memory_space<vmem>>, vector<1x1x16x16xbf16>
    %38 = vector.shape_cast %37 : vector<1x1x16x16xbf16> to vector<16x16xbf16>
    %cst_45 = arith.constant dense<0.000000e+00> : vector<8x16xf32>
    %39 = tpu.matmul %1, %38, %cst_45 {dimension_numbers = #tpu.dot_dimension_numbers<[1], [0], [0], [1], [0, 0, 1, 1], [], []>} : vector<8x16xbf16>, vector<16x16xbf16>, vector<8x16xf32> -> vector<8x16xf32>
    %40 = arith.truncf %39 : vector<8x16xf32> to vector<8x16xbf16>
    %c0_46 = arith.constant 0 : index
    %c5_47 = arith.constant 5 : index
    %c0_48 = arith.constant 0 : index
    %c0_49 = arith.constant 0 : index
    %41 = vector.load %arg3[%c0_46, %c5_47, %c0_48, %c0_49] : memref<1x8x8x16xbf16, #tpu.memory_space<vmem>>, vector<1x1x8x16xbf16>
    %42 = vector.shape_cast %41 : vector<1x1x8x16xbf16> to vector<8x16xbf16>
    %43 = vector.shape_cast %40 : vector<8x16xbf16> to vector<1x1x8x16xbf16>
    tpu.vector_store %arg3[%c0_46, %c5_47, %c0_48, %c0_49], %43 {strides = array<i32>} : memref<1x8x8x16xbf16, #tpu.memory_space<vmem>>, vector<1x1x8x16xbf16>,
    %c0_50 = arith.constant 0 : index
    %c6 = arith.constant 6 : index
    %c0_51 = arith.constant 0 : index
    %c0_52 = arith.constant 0 : index
    %44 = vector.load %arg2[%c0_50, %c6, %c0_51, %c0_52] : memref<1x8x16x16xbf16, #tpu.memory_space<vmem>>, vector<1x1x16x16xbf16>
    %45 = vector.shape_cast %44 : vector<1x1x16x16xbf16> to vector<16x16xbf16>
    %cst_53 = arith.constant dense<0.000000e+00> : vector<8x16xf32>
    %46 = tpu.matmul %1, %45, %cst_53 {dimension_numbers = #tpu.dot_dimension_numbers<[1], [0], [0], [1], [0, 0, 1, 1], [], []>} : vector<8x16xbf16>, vector<16x16xbf16>, vector<8x16xf32> -> vector<8x16xf32>
    %47 = arith.truncf %46 : vector<8x16xf32> to vector<8x16xbf16>
    %c0_54 = arith.constant 0 : index
    %c6_55 = arith.constant 6 : index
    %c0_56 = arith.constant 0 : index
    %c0_57 = arith.constant 0 : index
    %48 = vector.load %arg3[%c0_54, %c6_55, %c0_56, %c0_57] : memref<1x8x8x16xbf16, #tpu.memory_space<vmem>>, vector<1x1x8x16xbf16>
    %49 = vector.shape_cast %48 : vector<1x1x8x16xbf16> to vector<8x16xbf16>
    %50 = vector.shape_cast %47 : vector<8x16xbf16> to vector<1x1x8x16xbf16>
    tpu.vector_store %arg3[%c0_54, %c6_55, %c0_56, %c0_57], %50 {strides = array<i32>} : memref<1x8x8x16xbf16, #tpu.memory_space<vmem>>, vector<1x1x8x16xbf16>,
    %c0_58 = arith.constant 0 : index
    %c7 = arith.constant 7 : index
    %c0_59 = arith.constant 0 : index
    %c0_60 = arith.constant 0 : index
    %51 = vector.load %arg2[%c0_58, %c7, %c0_59, %c0_60] : memref<1x8x16x16xbf16, #tpu.memory_space<vmem>>, vector<1x1x16x16xbf16>
    %52 = vector.shape_cast %51 : vector<1x1x16x16xbf16> to vector<16x16xbf16>
    %cst_61 = arith.constant dense<0.000000e+00> : vector<8x16xf32>
    %53 = tpu.matmul %1, %52, %cst_61 {dimension_numbers = #tpu.dot_dimension_numbers<[1], [0], [0], [1], [0, 0, 1, 1], [], []>} : vector<8x16xbf16>, vector<16x16xbf16>, vector<8x16xf32> -> vector<8x16xf32>
    %54 = arith.truncf %53 : vector<8x16xf32> to vector<8x16xbf16>
    %c0_62 = arith.constant 0 : index
    %c7_63 = arith.constant 7 : index
    %c0_64 = arith.constant 0 : index
    %c0_65 = arith.constant 0 : index
    %55 = vector.load %arg3[%c0_62, %c7_63, %c0_64, %c0_65] : memref<1x8x8x16xbf16, #tpu.memory_space<vmem>>, vector<1x1x8x16xbf16>
    %56 = vector.shape_cast %55 : vector<1x1x8x16xbf16> to vector<8x16xbf16>
    %57 = vector.shape_cast %54 : vector<8x16xbf16> to vector<1x1x8x16xbf16>
    tpu.vector_store %arg3[%c0_62, %c7_63, %c0_64, %c0_65], %57 {strides = array<i32>} : memref<1x8x8x16xbf16, #tpu.memory_space<vmem>>, vector<1x1x8x16xbf16>,
    return
  }
  func.func @transform_0(%arg0: i32) -> (i32, i32, i32) {
    %c0_i32 = arith.constant 0 : i32
    %c0_i32_0 = arith.constant 0 : i32
    %c0_i32_1 = arith.constant 0 : i32
    return %arg0, %c0_i32, %c0_i32_0 : i32, i32, i32
  }
  func.func @transform_1(%arg0: i32) -> (i32, i32, i32, i32) {
    %c0_i32 = arith.constant 0 : i32
    %c0_i32_0 = arith.constant 0 : i32
    %c0_i32_1 = arith.constant 0 : i32
    %c0_i32_2 = arith.constant 0 : i32
    return %arg0, %c0_i32, %c0_i32_0, %c0_i32_1 : i32, i32, i32, i32
  }
  func.func @transform_2(%arg0: i32) -> (i32, i32, i32, i32) {
    %c0_i32 = arith.constant 0 : i32
    %c0_i32_0 = arith.constant 0 : i32
    %c0_i32_1 = arith.constant 0 : i32
    %c0_i32_2 = arith.constant 0 : i32
    return %arg0, %c0_i32, %c0_i32_0, %c0_i32_1 : i32, i32, i32, i32
  }
}

module attributes {stable_mosaic.version = 11 : i64} {
  func.func @_bottleneck_kernel(%arg0: i32, %arg1: memref<128x16xbf16, #tpu.memory_space<vmem>>, %arg2: memref<16x64xbf16, #tpu.memory_space<vmem>>, %arg3: memref<9x32x1xf32, #tpu.memory_space<vmem>>, %arg4: memref<16x8xbf16, #tpu.memory_space<vmem>>, %arg5: memref<1x8xf32, #tpu.memory_space<vmem>>, %arg6: memref<9x8x8xbf16, #tpu.memory_space<vmem>>, %arg7: memref<1x8xf32, #tpu.memory_space<vmem>>, %arg8: memref<8x32xbf16, #tpu.memory_space<vmem>>, %arg9: memref<1x32xf32, #tpu.memory_space<vmem>>, %arg10: memref<16x32xbf16, #tpu.memory_space<vmem>>, %arg11: memref<1x32xf32, #tpu.memory_space<vmem>>, %arg12: memref<32x32xbf16, #tpu.memory_space<vmem>>) attributes {dimension_semantics = [#tpu.dimension_semantics<parallel>], iteration_bounds = array<i64: 2>, scalar_prefetch = 0 : i64, scratch_operands = 0 : i64, tpu.core_type = #tpu.core_type<tc>, window_params = [{transform_indices = @transform_0, window_bounds = array<i64: 128, 16>}, {pipeline_mode = #tpu.pipeline_mode<synchronous>, transform_indices = @transform_1, window_bounds = array<i64: 16, 64>}, {pipeline_mode = #tpu.pipeline_mode<synchronous>, transform_indices = @transform_2, window_bounds = array<i64: 9, 32, 1>}, {pipeline_mode = #tpu.pipeline_mode<synchronous>, transform_indices = @transform_3, window_bounds = array<i64: 16, 8>}, {pipeline_mode = #tpu.pipeline_mode<synchronous>, transform_indices = @transform_4, window_bounds = array<i64: 1, 8>}, {pipeline_mode = #tpu.pipeline_mode<synchronous>, transform_indices = @transform_5, window_bounds = array<i64: 9, 8, 8>}, {pipeline_mode = #tpu.pipeline_mode<synchronous>, transform_indices = @transform_6, window_bounds = array<i64: 1, 8>}, {pipeline_mode = #tpu.pipeline_mode<synchronous>, transform_indices = @transform_7, window_bounds = array<i64: 8, 32>}, {pipeline_mode = #tpu.pipeline_mode<synchronous>, transform_indices = @transform_8, window_bounds = array<i64: 1, 32>}, {pipeline_mode = #tpu.pipeline_mode<synchronous>, transform_indices = @transform_9, window_bounds = array<i64: 16, 32>}, {pipeline_mode = #tpu.pipeline_mode<synchronous>, transform_indices = @transform_10, window_bounds = array<i64: 1, 32>}, {transform_indices = @transform_11, window_bounds = array<i64: 32, 32>}]} {
    %c0 = arith.constant 0 : index
    %c0_0 = arith.constant 0 : index
    %0 = vector.load %arg2[%c0, %c0_0] : memref<16x64xbf16, #tpu.memory_space<vmem>>, vector<16x64xbf16>
    %c0_1 = arith.constant 0 : index
    %c0_2 = arith.constant 0 : index
    %1 = vector.load %arg1[%c0_1, %c0_2] : memref<128x16xbf16, #tpu.memory_space<vmem>>, vector<64x16xbf16>
    %cst = arith.constant dense<0.000000e+00> : vector<16x16xf32>
    %2 = tpu.matmul %0, %1, %cst {dimension_numbers = #tpu.dot_dimension_numbers<[1], [0], [0], [1], [0, 0, 1, 1], [], []>} : vector<16x64xbf16>, vector<64x16xbf16>, vector<16x16xf32> -> vector<16x16xf32>
    %c64 = arith.constant 64 : index
    %c0_3 = arith.constant 0 : index
    %3 = vector.load %arg1[%c64, %c0_3] : memref<128x16xbf16, #tpu.memory_space<vmem>>, vector<64x16xbf16>
    %cst_4 = arith.constant dense<0.000000e+00> : vector<16x16xf32>
    %4 = tpu.matmul %0, %3, %cst_4 {dimension_numbers = #tpu.dot_dimension_numbers<[1], [0], [0], [1], [0, 0, 1, 1], [], []>} : vector<16x64xbf16>, vector<64x16xbf16>, vector<16x16xf32> -> vector<16x16xf32>
    %5 = tpu.concatenate %2, %4 in 0 : vector<16x16xf32>, vector<16x16xf32> -> vector<32x16xf32>
    %6 = arith.truncf %5 : vector<32x16xf32> to vector<32x16xbf16>
    %c0_5 = arith.constant 0 : index
    %c0_6 = arith.constant 0 : index
    %7 = vector.load %arg4[%c0_5, %c0_6] : memref<16x8xbf16, #tpu.memory_space<vmem>>, vector<16x8xbf16>
    %cst_7 = arith.constant dense<0.000000e+00> : vector<32x8xf32>
    %8 = tpu.matmul %6, %7, %cst_7 {dimension_numbers = #tpu.dot_dimension_numbers<[1], [0], [0], [1], [0, 0, 1, 1], [], []>} : vector<32x16xbf16>, vector<16x8xbf16>, vector<32x8xf32> -> vector<32x8xf32>
    %c0_8 = arith.constant 0 : index
    %c0_9 = arith.constant 0 : index
    %9 = vector.load %arg5[%c0_8, %c0_9] : memref<1x8xf32, #tpu.memory_space<vmem>>, vector<1x8xf32>
    %10 = vector.broadcast %9 : vector<1x8xf32> to vector<32x8xf32>
    %11 = arith.addf %8, %10 : vector<32x8xf32>
    %cst_10 = arith.constant 0.000000e+00 : f32
    %12 = vector.broadcast %cst_10 : f32 to vector<32x8xf32>
    %13 = arith.maximumf %11, %12 : vector<32x8xf32>
    %14 = arith.truncf %13 : vector<32x8xf32> to vector<32x8xbf16>
    %cst_11 = arith.constant 0.000000e+00 : bf16
    %15 = vector.broadcast %cst_11 : bf16 to vector<5x8xbf16>
    %16 = tpu.concatenate %15, %14, %15 in 0 : vector<5x8xbf16>, vector<32x8xbf16>, vector<5x8xbf16> -> vector<42x8xbf16>
    %cst_12 = arith.constant 0.000000e+00 : f32
    %17 = vector.broadcast %cst_12 : f32 to vector<32x8xf32>
    %18 = vector.extract_strided_slice %16 {offsets = [0, 0], sizes = [32, 8], strides = [1, 1]} : vector<42x8xbf16> to vector<32x8xbf16>
    %c0_13 = arith.constant 0 : index
    %c0_14 = arith.constant 0 : index
    %c0_15 = arith.constant 0 : index
    %19 = vector.load %arg6[%c0_13, %c0_14, %c0_15] : memref<9x8x8xbf16, #tpu.memory_space<vmem>>, vector<1x8x8xbf16>
    %20 = vector.shape_cast %19 : vector<1x8x8xbf16> to vector<8x8xbf16>
    %cst_16 = arith.constant dense<0.000000e+00> : vector<32x8xf32>
    %21 = tpu.matmul %18, %20, %cst_16 {dimension_numbers = #tpu.dot_dimension_numbers<[1], [0], [0], [1], [0, 0, 1, 1], [], []>} : vector<32x8xbf16>, vector<8x8xbf16>, vector<32x8xf32> -> vector<32x8xf32>
    %c0_17 = arith.constant 0 : index
    %c0_18 = arith.constant 0 : index
    %c0_19 = arith.constant 0 : index
    %22 = vector.load %arg3[%c0_17, %c0_18, %c0_19] : memref<9x32x1xf32, #tpu.memory_space<vmem>>, vector<1x32x1xf32>
    %23 = vector.shape_cast %22 : vector<1x32x1xf32> to vector<32x1xf32>
    %24 = vector.broadcast %23 : vector<32x1xf32> to vector<32x8xf32>
    %25 = arith.mulf %21, %24 : vector<32x8xf32>
    %26 = arith.addf %17, %25 : vector<32x8xf32>
    %27 = vector.extract_strided_slice %16 {offsets = [1, 0], sizes = [32, 8], strides = [1, 1]} : vector<42x8xbf16> to vector<32x8xbf16>
    %c1 = arith.constant 1 : index
    %c0_20 = arith.constant 0 : index
    %c0_21 = arith.constant 0 : index
    %28 = vector.load %arg6[%c1, %c0_20, %c0_21] : memref<9x8x8xbf16, #tpu.memory_space<vmem>>, vector<1x8x8xbf16>
    %29 = vector.shape_cast %28 : vector<1x8x8xbf16> to vector<8x8xbf16>
    %cst_22 = arith.constant dense<0.000000e+00> : vector<32x8xf32>
    %30 = tpu.matmul %27, %29, %cst_22 {dimension_numbers = #tpu.dot_dimension_numbers<[1], [0], [0], [1], [0, 0, 1, 1], [], []>} : vector<32x8xbf16>, vector<8x8xbf16>, vector<32x8xf32> -> vector<32x8xf32>
    %c1_23 = arith.constant 1 : index
    %c0_24 = arith.constant 0 : index
    %c0_25 = arith.constant 0 : index
    %31 = vector.load %arg3[%c1_23, %c0_24, %c0_25] : memref<9x32x1xf32, #tpu.memory_space<vmem>>, vector<1x32x1xf32>
    %32 = vector.shape_cast %31 : vector<1x32x1xf32> to vector<32x1xf32>
    %33 = vector.broadcast %32 : vector<32x1xf32> to vector<32x8xf32>
    %34 = arith.mulf %30, %33 : vector<32x8xf32>
    %35 = arith.addf %26, %34 : vector<32x8xf32>
    %36 = vector.extract_strided_slice %16 {offsets = [2, 0], sizes = [32, 8], strides = [1, 1]} : vector<42x8xbf16> to vector<32x8xbf16>
    %c2 = arith.constant 2 : index
    %c0_26 = arith.constant 0 : index
    %c0_27 = arith.constant 0 : index
    %37 = vector.load %arg6[%c2, %c0_26, %c0_27] : memref<9x8x8xbf16, #tpu.memory_space<vmem>>, vector<1x8x8xbf16>
    %38 = vector.shape_cast %37 : vector<1x8x8xbf16> to vector<8x8xbf16>
    %cst_28 = arith.constant dense<0.000000e+00> : vector<32x8xf32>
    %39 = tpu.matmul %36, %38, %cst_28 {dimension_numbers = #tpu.dot_dimension_numbers<[1], [0], [0], [1], [0, 0, 1, 1], [], []>} : vector<32x8xbf16>, vector<8x8xbf16>, vector<32x8xf32> -> vector<32x8xf32>
    %c2_29 = arith.constant 2 : index
    %c0_30 = arith.constant 0 : index
    %c0_31 = arith.constant 0 : index
    %40 = vector.load %arg3[%c2_29, %c0_30, %c0_31] : memref<9x32x1xf32, #tpu.memory_space<vmem>>, vector<1x32x1xf32>
    %41 = vector.shape_cast %40 : vector<1x32x1xf32> to vector<32x1xf32>
    %42 = vector.broadcast %41 : vector<32x1xf32> to vector<32x8xf32>
    %43 = arith.mulf %39, %42 : vector<32x8xf32>
    %44 = arith.addf %35, %43 : vector<32x8xf32>
    %45 = vector.extract_strided_slice %16 {offsets = [4, 0], sizes = [32, 8], strides = [1, 1]} : vector<42x8xbf16> to vector<32x8xbf16>
    %c3 = arith.constant 3 : index
    %c0_32 = arith.constant 0 : index
    %c0_33 = arith.constant 0 : index
    %46 = vector.load %arg6[%c3, %c0_32, %c0_33] : memref<9x8x8xbf16, #tpu.memory_space<vmem>>, vector<1x8x8xbf16>
    %47 = vector.shape_cast %46 : vector<1x8x8xbf16> to vector<8x8xbf16>
    %cst_34 = arith.constant dense<0.000000e+00> : vector<32x8xf32>
    %48 = tpu.matmul %45, %47, %cst_34 {dimension_numbers = #tpu.dot_dimension_numbers<[1], [0], [0], [1], [0, 0, 1, 1], [], []>} : vector<32x8xbf16>, vector<8x8xbf16>, vector<32x8xf32> -> vector<32x8xf32>
    %c3_35 = arith.constant 3 : index
    %c0_36 = arith.constant 0 : index
    %c0_37 = arith.constant 0 : index
    %49 = vector.load %arg3[%c3_35, %c0_36, %c0_37] : memref<9x32x1xf32, #tpu.memory_space<vmem>>, vector<1x32x1xf32>
    %50 = vector.shape_cast %49 : vector<1x32x1xf32> to vector<32x1xf32>
    %51 = vector.broadcast %50 : vector<32x1xf32> to vector<32x8xf32>
    %52 = arith.mulf %48, %51 : vector<32x8xf32>
    %53 = arith.addf %44, %52 : vector<32x8xf32>
    %54 = vector.extract_strided_slice %16 {offsets = [5, 0], sizes = [32, 8], strides = [1, 1]} : vector<42x8xbf16> to vector<32x8xbf16>
    %c4 = arith.constant 4 : index
    %c0_38 = arith.constant 0 : index
    %c0_39 = arith.constant 0 : index
    %55 = vector.load %arg6[%c4, %c0_38, %c0_39] : memref<9x8x8xbf16, #tpu.memory_space<vmem>>, vector<1x8x8xbf16>
    %56 = vector.shape_cast %55 : vector<1x8x8xbf16> to vector<8x8xbf16>
    %cst_40 = arith.constant dense<0.000000e+00> : vector<32x8xf32>
    %57 = tpu.matmul %54, %56, %cst_40 {dimension_numbers = #tpu.dot_dimension_numbers<[1], [0], [0], [1], [0, 0, 1, 1], [], []>} : vector<32x8xbf16>, vector<8x8xbf16>, vector<32x8xf32> -> vector<32x8xf32>
    %c4_41 = arith.constant 4 : index
    %c0_42 = arith.constant 0 : index
    %c0_43 = arith.constant 0 : index
    %58 = vector.load %arg3[%c4_41, %c0_42, %c0_43] : memref<9x32x1xf32, #tpu.memory_space<vmem>>, vector<1x32x1xf32>
    %59 = vector.shape_cast %58 : vector<1x32x1xf32> to vector<32x1xf32>
    %60 = vector.broadcast %59 : vector<32x1xf32> to vector<32x8xf32>
    %61 = arith.mulf %57, %60 : vector<32x8xf32>
    %62 = arith.addf %53, %61 : vector<32x8xf32>
    %63 = vector.extract_strided_slice %16 {offsets = [6, 0], sizes = [32, 8], strides = [1, 1]} : vector<42x8xbf16> to vector<32x8xbf16>
    %c5 = arith.constant 5 : index
    %c0_44 = arith.constant 0 : index
    %c0_45 = arith.constant 0 : index
    %64 = vector.load %arg6[%c5, %c0_44, %c0_45] : memref<9x8x8xbf16, #tpu.memory_space<vmem>>, vector<1x8x8xbf16>
    %65 = vector.shape_cast %64 : vector<1x8x8xbf16> to vector<8x8xbf16>
    %cst_46 = arith.constant dense<0.000000e+00> : vector<32x8xf32>
    %66 = tpu.matmul %63, %65, %cst_46 {dimension_numbers = #tpu.dot_dimension_numbers<[1], [0], [0], [1], [0, 0, 1, 1], [], []>} : vector<32x8xbf16>, vector<8x8xbf16>, vector<32x8xf32> -> vector<32x8xf32>
    %c5_47 = arith.constant 5 : index
    %c0_48 = arith.constant 0 : index
    %c0_49 = arith.constant 0 : index
    %67 = vector.load %arg3[%c5_47, %c0_48, %c0_49] : memref<9x32x1xf32, #tpu.memory_space<vmem>>, vector<1x32x1xf32>
    %68 = vector.shape_cast %67 : vector<1x32x1xf32> to vector<32x1xf32>
    %69 = vector.broadcast %68 : vector<32x1xf32> to vector<32x8xf32>
    %70 = arith.mulf %66, %69 : vector<32x8xf32>
    %71 = arith.addf %62, %70 : vector<32x8xf32>
    %72 = vector.extract_strided_slice %16 {offsets = [8, 0], sizes = [32, 8], strides = [1, 1]} : vector<42x8xbf16> to vector<32x8xbf16>
    %c6 = arith.constant 6 : index
    %c0_50 = arith.constant 0 : index
    %c0_51 = arith.constant 0 : index
    %73 = vector.load %arg6[%c6, %c0_50, %c0_51] : memref<9x8x8xbf16, #tpu.memory_space<vmem>>, vector<1x8x8xbf16>
    %74 = vector.shape_cast %73 : vector<1x8x8xbf16> to vector<8x8xbf16>
    %cst_52 = arith.constant dense<0.000000e+00> : vector<32x8xf32>
    %75 = tpu.matmul %72, %74, %cst_52 {dimension_numbers = #tpu.dot_dimension_numbers<[1], [0], [0], [1], [0, 0, 1, 1], [], []>} : vector<32x8xbf16>, vector<8x8xbf16>, vector<32x8xf32> -> vector<32x8xf32>
    %c6_53 = arith.constant 6 : index
    %c0_54 = arith.constant 0 : index
    %c0_55 = arith.constant 0 : index
    %76 = vector.load %arg3[%c6_53, %c0_54, %c0_55] : memref<9x32x1xf32, #tpu.memory_space<vmem>>, vector<1x32x1xf32>
    %77 = vector.shape_cast %76 : vector<1x32x1xf32> to vector<32x1xf32>
    %78 = vector.broadcast %77 : vector<32x1xf32> to vector<32x8xf32>
    %79 = arith.mulf %75, %78 : vector<32x8xf32>
    %80 = arith.addf %71, %79 : vector<32x8xf32>
    %81 = vector.extract_strided_slice %16 {offsets = [9, 0], sizes = [32, 8], strides = [1, 1]} : vector<42x8xbf16> to vector<32x8xbf16>
    %c7 = arith.constant 7 : index
    %c0_56 = arith.constant 0 : index
    %c0_57 = arith.constant 0 : index
    %82 = vector.load %arg6[%c7, %c0_56, %c0_57] : memref<9x8x8xbf16, #tpu.memory_space<vmem>>, vector<1x8x8xbf16>
    %83 = vector.shape_cast %82 : vector<1x8x8xbf16> to vector<8x8xbf16>
    %cst_58 = arith.constant dense<0.000000e+00> : vector<32x8xf32>
    %84 = tpu.matmul %81, %83, %cst_58 {dimension_numbers = #tpu.dot_dimension_numbers<[1], [0], [0], [1], [0, 0, 1, 1], [], []>} : vector<32x8xbf16>, vector<8x8xbf16>, vector<32x8xf32> -> vector<32x8xf32>
    %c7_59 = arith.constant 7 : index
    %c0_60 = arith.constant 0 : index
    %c0_61 = arith.constant 0 : index
    %85 = vector.load %arg3[%c7_59, %c0_60, %c0_61] : memref<9x32x1xf32, #tpu.memory_space<vmem>>, vector<1x32x1xf32>
    %86 = vector.shape_cast %85 : vector<1x32x1xf32> to vector<32x1xf32>
    %87 = vector.broadcast %86 : vector<32x1xf32> to vector<32x8xf32>
    %88 = arith.mulf %84, %87 : vector<32x8xf32>
    %89 = arith.addf %80, %88 : vector<32x8xf32>
    %90 = vector.extract_strided_slice %16 {offsets = [10, 0], sizes = [32, 8], strides = [1, 1]} : vector<42x8xbf16> to vector<32x8xbf16>
    %c8 = arith.constant 8 : index
    %c0_62 = arith.constant 0 : index
    %c0_63 = arith.constant 0 : index
    %91 = vector.load %arg6[%c8, %c0_62, %c0_63] : memref<9x8x8xbf16, #tpu.memory_space<vmem>>, vector<1x8x8xbf16>
    %92 = vector.shape_cast %91 : vector<1x8x8xbf16> to vector<8x8xbf16>
    %cst_64 = arith.constant dense<0.000000e+00> : vector<32x8xf32>
    %93 = tpu.matmul %90, %92, %cst_64 {dimension_numbers = #tpu.dot_dimension_numbers<[1], [0], [0], [1], [0, 0, 1, 1], [], []>} : vector<32x8xbf16>, vector<8x8xbf16>, vector<32x8xf32> -> vector<32x8xf32>
    %c8_65 = arith.constant 8 : index
    %c0_66 = arith.constant 0 : index
    %c0_67 = arith.constant 0 : index
    %94 = vector.load %arg3[%c8_65, %c0_66, %c0_67] : memref<9x32x1xf32, #tpu.memory_space<vmem>>, vector<1x32x1xf32>
    %95 = vector.shape_cast %94 : vector<1x32x1xf32> to vector<32x1xf32>
    %96 = vector.broadcast %95 : vector<32x1xf32> to vector<32x8xf32>
    %97 = arith.mulf %93, %96 : vector<32x8xf32>
    %98 = arith.addf %89, %97 : vector<32x8xf32>
    %c0_68 = arith.constant 0 : index
    %c0_69 = arith.constant 0 : index
    %99 = vector.load %arg7[%c0_68, %c0_69] : memref<1x8xf32, #tpu.memory_space<vmem>>, vector<1x8xf32>
    %100 = vector.broadcast %99 : vector<1x8xf32> to vector<32x8xf32>
    %101 = arith.addf %98, %100 : vector<32x8xf32>
    %cst_70 = arith.constant 0.000000e+00 : f32
    %102 = vector.broadcast %cst_70 : f32 to vector<32x8xf32>
    %103 = arith.maximumf %101, %102 : vector<32x8xf32>
    %104 = arith.truncf %103 : vector<32x8xf32> to vector<32x8xbf16>
    %c0_71 = arith.constant 0 : index
    %c0_72 = arith.constant 0 : index
    %105 = vector.load %arg8[%c0_71, %c0_72] : memref<8x32xbf16, #tpu.memory_space<vmem>>, vector<8x32xbf16>
    %cst_73 = arith.constant dense<0.000000e+00> : vector<32x32xf32>
    %106 = tpu.matmul %104, %105, %cst_73 {dimension_numbers = #tpu.dot_dimension_numbers<[1], [0], [0], [1], [0, 0, 1, 1], [], []>} : vector<32x8xbf16>, vector<8x32xbf16>, vector<32x32xf32> -> vector<32x32xf32>
    %c0_74 = arith.constant 0 : index
    %c0_75 = arith.constant 0 : index
    %107 = vector.load %arg9[%c0_74, %c0_75] : memref<1x32xf32, #tpu.memory_space<vmem>>, vector<1x32xf32>
    %108 = vector.broadcast %107 : vector<1x32xf32> to vector<32x32xf32>
    %109 = arith.addf %106, %108 : vector<32x32xf32>
    %c0_76 = arith.constant 0 : index
    %c0_77 = arith.constant 0 : index
    %110 = vector.load %arg10[%c0_76, %c0_77] : memref<16x32xbf16, #tpu.memory_space<vmem>>, vector<16x32xbf16>
    %cst_78 = arith.constant dense<0.000000e+00> : vector<32x32xf32>
    %111 = tpu.matmul %6, %110, %cst_78 {dimension_numbers = #tpu.dot_dimension_numbers<[1], [0], [0], [1], [0, 0, 1, 1], [], []>} : vector<32x16xbf16>, vector<16x32xbf16>, vector<32x32xf32> -> vector<32x32xf32>
    %c0_79 = arith.constant 0 : index
    %c0_80 = arith.constant 0 : index
    %112 = vector.load %arg11[%c0_79, %c0_80] : memref<1x32xf32, #tpu.memory_space<vmem>>, vector<1x32xf32>
    %113 = vector.broadcast %112 : vector<1x32xf32> to vector<32x32xf32>
    %114 = arith.addf %111, %113 : vector<32x32xf32>
    %115 = arith.addf %109, %114 : vector<32x32xf32>
    %cst_81 = arith.constant 0.000000e+00 : f32
    %116 = vector.broadcast %cst_81 : f32 to vector<32x32xf32>
    %117 = arith.maximumf %115, %116 : vector<32x32xf32>
    %118 = arith.truncf %117 : vector<32x32xf32> to vector<32x32xbf16>
    %c0_82 = arith.constant 0 : index
    %c0_83 = arith.constant 0 : index
    %119 = vector.load %arg12[%c0_82, %c0_83] : memref<32x32xbf16, #tpu.memory_space<vmem>>, vector<32x32xbf16>
    tpu.vector_store %arg12[%c0_82, %c0_83], %118 {strides = array<i32>} : memref<32x32xbf16, #tpu.memory_space<vmem>>, vector<32x32xbf16>,
    return
  }
  func.func @transform_0(%arg0: i32) -> (i32, i32) {
    %c0_i32 = arith.constant 0 : i32
    %c0_i32_0 = arith.constant 0 : i32
    return %arg0, %c0_i32 : i32, i32
  }
  func.func @transform_1(%arg0: i32) -> (i32, i32) {
    %c0_i32 = arith.constant 0 : i32
    %c0_i32_0 = arith.constant 0 : i32
    %c0_i32_1 = arith.constant 0 : i32
    return %c0_i32, %c0_i32_0 : i32, i32
  }
  func.func @transform_2(%arg0: i32) -> (i32, i32, i32) {
    %c0_i32 = arith.constant 0 : i32
    %c0_i32_0 = arith.constant 0 : i32
    %c0_i32_1 = arith.constant 0 : i32
    %c0_i32_2 = arith.constant 0 : i32
    return %c0_i32, %c0_i32_0, %c0_i32_1 : i32, i32, i32
  }
  func.func @transform_3(%arg0: i32) -> (i32, i32) {
    %c0_i32 = arith.constant 0 : i32
    %c0_i32_0 = arith.constant 0 : i32
    %c0_i32_1 = arith.constant 0 : i32
    return %c0_i32, %c0_i32_0 : i32, i32
  }
  func.func @transform_4(%arg0: i32) -> (i32, i32) {
    %c0_i32 = arith.constant 0 : i32
    %c0_i32_0 = arith.constant 0 : i32
    %c0_i32_1 = arith.constant 0 : i32
    return %c0_i32, %c0_i32_0 : i32, i32
  }
  func.func @transform_5(%arg0: i32) -> (i32, i32, i32) {
    %c0_i32 = arith.constant 0 : i32
    %c0_i32_0 = arith.constant 0 : i32
    %c0_i32_1 = arith.constant 0 : i32
    %c0_i32_2 = arith.constant 0 : i32
    return %c0_i32, %c0_i32_0, %c0_i32_1 : i32, i32, i32
  }
  func.func @transform_6(%arg0: i32) -> (i32, i32) {
    %c0_i32 = arith.constant 0 : i32
    %c0_i32_0 = arith.constant 0 : i32
    %c0_i32_1 = arith.constant 0 : i32
    return %c0_i32, %c0_i32_0 : i32, i32
  }
  func.func @transform_7(%arg0: i32) -> (i32, i32) {
    %c0_i32 = arith.constant 0 : i32
    %c0_i32_0 = arith.constant 0 : i32
    %c0_i32_1 = arith.constant 0 : i32
    return %c0_i32, %c0_i32_0 : i32, i32
  }
  func.func @transform_8(%arg0: i32) -> (i32, i32) {
    %c0_i32 = arith.constant 0 : i32
    %c0_i32_0 = arith.constant 0 : i32
    %c0_i32_1 = arith.constant 0 : i32
    return %c0_i32, %c0_i32_0 : i32, i32
  }
  func.func @transform_9(%arg0: i32) -> (i32, i32) {
    %c0_i32 = arith.constant 0 : i32
    %c0_i32_0 = arith.constant 0 : i32
    %c0_i32_1 = arith.constant 0 : i32
    return %c0_i32, %c0_i32_0 : i32, i32
  }
  func.func @transform_10(%arg0: i32) -> (i32, i32) {
    %c0_i32 = arith.constant 0 : i32
    %c0_i32_0 = arith.constant 0 : i32
    %c0_i32_1 = arith.constant 0 : i32
    return %c0_i32, %c0_i32_0 : i32, i32
  }
  func.func @transform_11(%arg0: i32) -> (i32, i32) {
    %c0_i32 = arith.constant 0 : i32
    %c0_i32_0 = arith.constant 0 : i32
    return %arg0, %c0_i32 : i32, i32
  }
}

module attributes {stable_mosaic.version = 11 : i64} {
  func.func @_bottleneck_kernel(%arg0: i32, %arg1: memref<32x32xbf16, #tpu.memory_space<vmem>>, %arg2: memref<9x32x1xf32, #tpu.memory_space<vmem>>, %arg3: memref<32x8xbf16, #tpu.memory_space<vmem>>, %arg4: memref<1x8xf32, #tpu.memory_space<vmem>>, %arg5: memref<9x8x8xbf16, #tpu.memory_space<vmem>>, %arg6: memref<1x8xf32, #tpu.memory_space<vmem>>, %arg7: memref<8x32xbf16, #tpu.memory_space<vmem>>, %arg8: memref<1x32xf32, #tpu.memory_space<vmem>>, %arg9: memref<32x32xbf16, #tpu.memory_space<vmem>>) attributes {dimension_semantics = [#tpu.dimension_semantics<parallel>], iteration_bounds = array<i64: 2>, scalar_prefetch = 0 : i64, scratch_operands = 0 : i64, tpu.core_type = #tpu.core_type<tc>, window_params = [{transform_indices = @transform_0, window_bounds = array<i64: 32, 32>}, {pipeline_mode = #tpu.pipeline_mode<synchronous>, transform_indices = @transform_1, window_bounds = array<i64: 9, 32, 1>}, {pipeline_mode = #tpu.pipeline_mode<synchronous>, transform_indices = @transform_2, window_bounds = array<i64: 32, 8>}, {pipeline_mode = #tpu.pipeline_mode<synchronous>, transform_indices = @transform_3, window_bounds = array<i64: 1, 8>}, {pipeline_mode = #tpu.pipeline_mode<synchronous>, transform_indices = @transform_4, window_bounds = array<i64: 9, 8, 8>}, {pipeline_mode = #tpu.pipeline_mode<synchronous>, transform_indices = @transform_5, window_bounds = array<i64: 1, 8>}, {pipeline_mode = #tpu.pipeline_mode<synchronous>, transform_indices = @transform_6, window_bounds = array<i64: 8, 32>}, {pipeline_mode = #tpu.pipeline_mode<synchronous>, transform_indices = @transform_7, window_bounds = array<i64: 1, 32>}, {transform_indices = @transform_8, window_bounds = array<i64: 32, 32>}]} {
    %c0 = arith.constant 0 : index
    %c0_0 = arith.constant 0 : index
    %0 = vector.load %arg1[%c0, %c0_0] : memref<32x32xbf16, #tpu.memory_space<vmem>>, vector<32x32xbf16>
    %c0_1 = arith.constant 0 : index
    %c0_2 = arith.constant 0 : index
    %1 = vector.load %arg3[%c0_1, %c0_2] : memref<32x8xbf16, #tpu.memory_space<vmem>>, vector<32x8xbf16>
    %cst = arith.constant dense<0.000000e+00> : vector<32x8xf32>
    %2 = tpu.matmul %0, %1, %cst {dimension_numbers = #tpu.dot_dimension_numbers<[1], [0], [0], [1], [0, 0, 1, 1], [], []>} : vector<32x32xbf16>, vector<32x8xbf16>, vector<32x8xf32> -> vector<32x8xf32>
    %c0_3 = arith.constant 0 : index
    %c0_4 = arith.constant 0 : index
    %3 = vector.load %arg4[%c0_3, %c0_4] : memref<1x8xf32, #tpu.memory_space<vmem>>, vector<1x8xf32>
    %4 = vector.broadcast %3 : vector<1x8xf32> to vector<32x8xf32>
    %5 = arith.addf %2, %4 : vector<32x8xf32>
    %cst_5 = arith.constant 0.000000e+00 : f32
    %6 = vector.broadcast %cst_5 : f32 to vector<32x8xf32>
    %7 = arith.maximumf %5, %6 : vector<32x8xf32>
    %8 = arith.truncf %7 : vector<32x8xf32> to vector<32x8xbf16>
    %cst_6 = arith.constant 0.000000e+00 : bf16
    %9 = vector.broadcast %cst_6 : bf16 to vector<5x8xbf16>
    %10 = tpu.concatenate %9, %8, %9 in 0 : vector<5x8xbf16>, vector<32x8xbf16>, vector<5x8xbf16> -> vector<42x8xbf16>
    %cst_7 = arith.constant 0.000000e+00 : f32
    %11 = vector.broadcast %cst_7 : f32 to vector<32x8xf32>
    %12 = vector.extract_strided_slice %10 {offsets = [0, 0], sizes = [32, 8], strides = [1, 1]} : vector<42x8xbf16> to vector<32x8xbf16>
    %c0_8 = arith.constant 0 : index
    %c0_9 = arith.constant 0 : index
    %c0_10 = arith.constant 0 : index
    %13 = vector.load %arg5[%c0_8, %c0_9, %c0_10] : memref<9x8x8xbf16, #tpu.memory_space<vmem>>, vector<1x8x8xbf16>
    %14 = vector.shape_cast %13 : vector<1x8x8xbf16> to vector<8x8xbf16>
    %cst_11 = arith.constant dense<0.000000e+00> : vector<32x8xf32>
    %15 = tpu.matmul %12, %14, %cst_11 {dimension_numbers = #tpu.dot_dimension_numbers<[1], [0], [0], [1], [0, 0, 1, 1], [], []>} : vector<32x8xbf16>, vector<8x8xbf16>, vector<32x8xf32> -> vector<32x8xf32>
    %c0_12 = arith.constant 0 : index
    %c0_13 = arith.constant 0 : index
    %c0_14 = arith.constant 0 : index
    %16 = vector.load %arg2[%c0_12, %c0_13, %c0_14] : memref<9x32x1xf32, #tpu.memory_space<vmem>>, vector<1x32x1xf32>
    %17 = vector.shape_cast %16 : vector<1x32x1xf32> to vector<32x1xf32>
    %18 = vector.broadcast %17 : vector<32x1xf32> to vector<32x8xf32>
    %19 = arith.mulf %15, %18 : vector<32x8xf32>
    %20 = arith.addf %11, %19 : vector<32x8xf32>
    %21 = vector.extract_strided_slice %10 {offsets = [1, 0], sizes = [32, 8], strides = [1, 1]} : vector<42x8xbf16> to vector<32x8xbf16>
    %c1 = arith.constant 1 : index
    %c0_15 = arith.constant 0 : index
    %c0_16 = arith.constant 0 : index
    %22 = vector.load %arg5[%c1, %c0_15, %c0_16] : memref<9x8x8xbf16, #tpu.memory_space<vmem>>, vector<1x8x8xbf16>
    %23 = vector.shape_cast %22 : vector<1x8x8xbf16> to vector<8x8xbf16>
    %cst_17 = arith.constant dense<0.000000e+00> : vector<32x8xf32>
    %24 = tpu.matmul %21, %23, %cst_17 {dimension_numbers = #tpu.dot_dimension_numbers<[1], [0], [0], [1], [0, 0, 1, 1], [], []>} : vector<32x8xbf16>, vector<8x8xbf16>, vector<32x8xf32> -> vector<32x8xf32>
    %c1_18 = arith.constant 1 : index
    %c0_19 = arith.constant 0 : index
    %c0_20 = arith.constant 0 : index
    %25 = vector.load %arg2[%c1_18, %c0_19, %c0_20] : memref<9x32x1xf32, #tpu.memory_space<vmem>>, vector<1x32x1xf32>
    %26 = vector.shape_cast %25 : vector<1x32x1xf32> to vector<32x1xf32>
    %27 = vector.broadcast %26 : vector<32x1xf32> to vector<32x8xf32>
    %28 = arith.mulf %24, %27 : vector<32x8xf32>
    %29 = arith.addf %20, %28 : vector<32x8xf32>
    %30 = vector.extract_strided_slice %10 {offsets = [2, 0], sizes = [32, 8], strides = [1, 1]} : vector<42x8xbf16> to vector<32x8xbf16>
    %c2 = arith.constant 2 : index
    %c0_21 = arith.constant 0 : index
    %c0_22 = arith.constant 0 : index
    %31 = vector.load %arg5[%c2, %c0_21, %c0_22] : memref<9x8x8xbf16, #tpu.memory_space<vmem>>, vector<1x8x8xbf16>
    %32 = vector.shape_cast %31 : vector<1x8x8xbf16> to vector<8x8xbf16>
    %cst_23 = arith.constant dense<0.000000e+00> : vector<32x8xf32>
    %33 = tpu.matmul %30, %32, %cst_23 {dimension_numbers = #tpu.dot_dimension_numbers<[1], [0], [0], [1], [0, 0, 1, 1], [], []>} : vector<32x8xbf16>, vector<8x8xbf16>, vector<32x8xf32> -> vector<32x8xf32>
    %c2_24 = arith.constant 2 : index
    %c0_25 = arith.constant 0 : index
    %c0_26 = arith.constant 0 : index
    %34 = vector.load %arg2[%c2_24, %c0_25, %c0_26] : memref<9x32x1xf32, #tpu.memory_space<vmem>>, vector<1x32x1xf32>
    %35 = vector.shape_cast %34 : vector<1x32x1xf32> to vector<32x1xf32>
    %36 = vector.broadcast %35 : vector<32x1xf32> to vector<32x8xf32>
    %37 = arith.mulf %33, %36 : vector<32x8xf32>
    %38 = arith.addf %29, %37 : vector<32x8xf32>
    %39 = vector.extract_strided_slice %10 {offsets = [4, 0], sizes = [32, 8], strides = [1, 1]} : vector<42x8xbf16> to vector<32x8xbf16>
    %c3 = arith.constant 3 : index
    %c0_27 = arith.constant 0 : index
    %c0_28 = arith.constant 0 : index
    %40 = vector.load %arg5[%c3, %c0_27, %c0_28] : memref<9x8x8xbf16, #tpu.memory_space<vmem>>, vector<1x8x8xbf16>
    %41 = vector.shape_cast %40 : vector<1x8x8xbf16> to vector<8x8xbf16>
    %cst_29 = arith.constant dense<0.000000e+00> : vector<32x8xf32>
    %42 = tpu.matmul %39, %41, %cst_29 {dimension_numbers = #tpu.dot_dimension_numbers<[1], [0], [0], [1], [0, 0, 1, 1], [], []>} : vector<32x8xbf16>, vector<8x8xbf16>, vector<32x8xf32> -> vector<32x8xf32>
    %c3_30 = arith.constant 3 : index
    %c0_31 = arith.constant 0 : index
    %c0_32 = arith.constant 0 : index
    %43 = vector.load %arg2[%c3_30, %c0_31, %c0_32] : memref<9x32x1xf32, #tpu.memory_space<vmem>>, vector<1x32x1xf32>
    %44 = vector.shape_cast %43 : vector<1x32x1xf32> to vector<32x1xf32>
    %45 = vector.broadcast %44 : vector<32x1xf32> to vector<32x8xf32>
    %46 = arith.mulf %42, %45 : vector<32x8xf32>
    %47 = arith.addf %38, %46 : vector<32x8xf32>
    %48 = vector.extract_strided_slice %10 {offsets = [5, 0], sizes = [32, 8], strides = [1, 1]} : vector<42x8xbf16> to vector<32x8xbf16>
    %c4 = arith.constant 4 : index
    %c0_33 = arith.constant 0 : index
    %c0_34 = arith.constant 0 : index
    %49 = vector.load %arg5[%c4, %c0_33, %c0_34] : memref<9x8x8xbf16, #tpu.memory_space<vmem>>, vector<1x8x8xbf16>
    %50 = vector.shape_cast %49 : vector<1x8x8xbf16> to vector<8x8xbf16>
    %cst_35 = arith.constant dense<0.000000e+00> : vector<32x8xf32>
    %51 = tpu.matmul %48, %50, %cst_35 {dimension_numbers = #tpu.dot_dimension_numbers<[1], [0], [0], [1], [0, 0, 1, 1], [], []>} : vector<32x8xbf16>, vector<8x8xbf16>, vector<32x8xf32> -> vector<32x8xf32>
    %c4_36 = arith.constant 4 : index
    %c0_37 = arith.constant 0 : index
    %c0_38 = arith.constant 0 : index
    %52 = vector.load %arg2[%c4_36, %c0_37, %c0_38] : memref<9x32x1xf32, #tpu.memory_space<vmem>>, vector<1x32x1xf32>
    %53 = vector.shape_cast %52 : vector<1x32x1xf32> to vector<32x1xf32>
    %54 = vector.broadcast %53 : vector<32x1xf32> to vector<32x8xf32>
    %55 = arith.mulf %51, %54 : vector<32x8xf32>
    %56 = arith.addf %47, %55 : vector<32x8xf32>
    %57 = vector.extract_strided_slice %10 {offsets = [6, 0], sizes = [32, 8], strides = [1, 1]} : vector<42x8xbf16> to vector<32x8xbf16>
    %c5 = arith.constant 5 : index
    %c0_39 = arith.constant 0 : index
    %c0_40 = arith.constant 0 : index
    %58 = vector.load %arg5[%c5, %c0_39, %c0_40] : memref<9x8x8xbf16, #tpu.memory_space<vmem>>, vector<1x8x8xbf16>
    %59 = vector.shape_cast %58 : vector<1x8x8xbf16> to vector<8x8xbf16>
    %cst_41 = arith.constant dense<0.000000e+00> : vector<32x8xf32>
    %60 = tpu.matmul %57, %59, %cst_41 {dimension_numbers = #tpu.dot_dimension_numbers<[1], [0], [0], [1], [0, 0, 1, 1], [], []>} : vector<32x8xbf16>, vector<8x8xbf16>, vector<32x8xf32> -> vector<32x8xf32>
    %c5_42 = arith.constant 5 : index
    %c0_43 = arith.constant 0 : index
    %c0_44 = arith.constant 0 : index
    %61 = vector.load %arg2[%c5_42, %c0_43, %c0_44] : memref<9x32x1xf32, #tpu.memory_space<vmem>>, vector<1x32x1xf32>
    %62 = vector.shape_cast %61 : vector<1x32x1xf32> to vector<32x1xf32>
    %63 = vector.broadcast %62 : vector<32x1xf32> to vector<32x8xf32>
    %64 = arith.mulf %60, %63 : vector<32x8xf32>
    %65 = arith.addf %56, %64 : vector<32x8xf32>
    %66 = vector.extract_strided_slice %10 {offsets = [8, 0], sizes = [32, 8], strides = [1, 1]} : vector<42x8xbf16> to vector<32x8xbf16>
    %c6 = arith.constant 6 : index
    %c0_45 = arith.constant 0 : index
    %c0_46 = arith.constant 0 : index
    %67 = vector.load %arg5[%c6, %c0_45, %c0_46] : memref<9x8x8xbf16, #tpu.memory_space<vmem>>, vector<1x8x8xbf16>
    %68 = vector.shape_cast %67 : vector<1x8x8xbf16> to vector<8x8xbf16>
    %cst_47 = arith.constant dense<0.000000e+00> : vector<32x8xf32>
    %69 = tpu.matmul %66, %68, %cst_47 {dimension_numbers = #tpu.dot_dimension_numbers<[1], [0], [0], [1], [0, 0, 1, 1], [], []>} : vector<32x8xbf16>, vector<8x8xbf16>, vector<32x8xf32> -> vector<32x8xf32>
    %c6_48 = arith.constant 6 : index
    %c0_49 = arith.constant 0 : index
    %c0_50 = arith.constant 0 : index
    %70 = vector.load %arg2[%c6_48, %c0_49, %c0_50] : memref<9x32x1xf32, #tpu.memory_space<vmem>>, vector<1x32x1xf32>
    %71 = vector.shape_cast %70 : vector<1x32x1xf32> to vector<32x1xf32>
    %72 = vector.broadcast %71 : vector<32x1xf32> to vector<32x8xf32>
    %73 = arith.mulf %69, %72 : vector<32x8xf32>
    %74 = arith.addf %65, %73 : vector<32x8xf32>
    %75 = vector.extract_strided_slice %10 {offsets = [9, 0], sizes = [32, 8], strides = [1, 1]} : vector<42x8xbf16> to vector<32x8xbf16>
    %c7 = arith.constant 7 : index
    %c0_51 = arith.constant 0 : index
    %c0_52 = arith.constant 0 : index
    %76 = vector.load %arg5[%c7, %c0_51, %c0_52] : memref<9x8x8xbf16, #tpu.memory_space<vmem>>, vector<1x8x8xbf16>
    %77 = vector.shape_cast %76 : vector<1x8x8xbf16> to vector<8x8xbf16>
    %cst_53 = arith.constant dense<0.000000e+00> : vector<32x8xf32>
    %78 = tpu.matmul %75, %77, %cst_53 {dimension_numbers = #tpu.dot_dimension_numbers<[1], [0], [0], [1], [0, 0, 1, 1], [], []>} : vector<32x8xbf16>, vector<8x8xbf16>, vector<32x8xf32> -> vector<32x8xf32>
    %c7_54 = arith.constant 7 : index
    %c0_55 = arith.constant 0 : index
    %c0_56 = arith.constant 0 : index
    %79 = vector.load %arg2[%c7_54, %c0_55, %c0_56] : memref<9x32x1xf32, #tpu.memory_space<vmem>>, vector<1x32x1xf32>
    %80 = vector.shape_cast %79 : vector<1x32x1xf32> to vector<32x1xf32>
    %81 = vector.broadcast %80 : vector<32x1xf32> to vector<32x8xf32>
    %82 = arith.mulf %78, %81 : vector<32x8xf32>
    %83 = arith.addf %74, %82 : vector<32x8xf32>
    %84 = vector.extract_strided_slice %10 {offsets = [10, 0], sizes = [32, 8], strides = [1, 1]} : vector<42x8xbf16> to vector<32x8xbf16>
    %c8 = arith.constant 8 : index
    %c0_57 = arith.constant 0 : index
    %c0_58 = arith.constant 0 : index
    %85 = vector.load %arg5[%c8, %c0_57, %c0_58] : memref<9x8x8xbf16, #tpu.memory_space<vmem>>, vector<1x8x8xbf16>
    %86 = vector.shape_cast %85 : vector<1x8x8xbf16> to vector<8x8xbf16>
    %cst_59 = arith.constant dense<0.000000e+00> : vector<32x8xf32>
    %87 = tpu.matmul %84, %86, %cst_59 {dimension_numbers = #tpu.dot_dimension_numbers<[1], [0], [0], [1], [0, 0, 1, 1], [], []>} : vector<32x8xbf16>, vector<8x8xbf16>, vector<32x8xf32> -> vector<32x8xf32>
    %c8_60 = arith.constant 8 : index
    %c0_61 = arith.constant 0 : index
    %c0_62 = arith.constant 0 : index
    %88 = vector.load %arg2[%c8_60, %c0_61, %c0_62] : memref<9x32x1xf32, #tpu.memory_space<vmem>>, vector<1x32x1xf32>
    %89 = vector.shape_cast %88 : vector<1x32x1xf32> to vector<32x1xf32>
    %90 = vector.broadcast %89 : vector<32x1xf32> to vector<32x8xf32>
    %91 = arith.mulf %87, %90 : vector<32x8xf32>
    %92 = arith.addf %83, %91 : vector<32x8xf32>
    %c0_63 = arith.constant 0 : index
    %c0_64 = arith.constant 0 : index
    %93 = vector.load %arg6[%c0_63, %c0_64] : memref<1x8xf32, #tpu.memory_space<vmem>>, vector<1x8xf32>
    %94 = vector.broadcast %93 : vector<1x8xf32> to vector<32x8xf32>
    %95 = arith.addf %92, %94 : vector<32x8xf32>
    %cst_65 = arith.constant 0.000000e+00 : f32
    %96 = vector.broadcast %cst_65 : f32 to vector<32x8xf32>
    %97 = arith.maximumf %95, %96 : vector<32x8xf32>
    %98 = arith.truncf %97 : vector<32x8xf32> to vector<32x8xbf16>
    %c0_66 = arith.constant 0 : index
    %c0_67 = arith.constant 0 : index
    %99 = vector.load %arg7[%c0_66, %c0_67] : memref<8x32xbf16, #tpu.memory_space<vmem>>, vector<8x32xbf16>
    %cst_68 = arith.constant dense<0.000000e+00> : vector<32x32xf32>
    %100 = tpu.matmul %98, %99, %cst_68 {dimension_numbers = #tpu.dot_dimension_numbers<[1], [0], [0], [1], [0, 0, 1, 1], [], []>} : vector<32x8xbf16>, vector<8x32xbf16>, vector<32x32xf32> -> vector<32x32xf32>
    %c0_69 = arith.constant 0 : index
    %c0_70 = arith.constant 0 : index
    %101 = vector.load %arg8[%c0_69, %c0_70] : memref<1x32xf32, #tpu.memory_space<vmem>>, vector<1x32xf32>
    %102 = vector.broadcast %101 : vector<1x32xf32> to vector<32x32xf32>
    %103 = arith.addf %100, %102 : vector<32x32xf32>
    %104 = arith.extf %0 : vector<32x32xbf16> to vector<32x32xf32>
    %105 = arith.addf %103, %104 : vector<32x32xf32>
    %cst_71 = arith.constant 0.000000e+00 : f32
    %106 = vector.broadcast %cst_71 : f32 to vector<32x32xf32>
    %107 = arith.maximumf %105, %106 : vector<32x32xf32>
    %108 = arith.truncf %107 : vector<32x32xf32> to vector<32x32xbf16>
    %c0_72 = arith.constant 0 : index
    %c0_73 = arith.constant 0 : index
    %109 = vector.load %arg9[%c0_72, %c0_73] : memref<32x32xbf16, #tpu.memory_space<vmem>>, vector<32x32xbf16>
    tpu.vector_store %arg9[%c0_72, %c0_73], %108 {strides = array<i32>} : memref<32x32xbf16, #tpu.memory_space<vmem>>, vector<32x32xbf16>,
    return
  }
  func.func @transform_0(%arg0: i32) -> (i32, i32) {
    %c0_i32 = arith.constant 0 : i32
    %c0_i32_0 = arith.constant 0 : i32
    return %arg0, %c0_i32 : i32, i32
  }
  func.func @transform_1(%arg0: i32) -> (i32, i32, i32) {
    %c0_i32 = arith.constant 0 : i32
    %c0_i32_0 = arith.constant 0 : i32
    %c0_i32_1 = arith.constant 0 : i32
    %c0_i32_2 = arith.constant 0 : i32
    return %c0_i32, %c0_i32_0, %c0_i32_1 : i32, i32, i32
  }
  func.func @transform_2(%arg0: i32) -> (i32, i32) {
    %c0_i32 = arith.constant 0 : i32
    %c0_i32_0 = arith.constant 0 : i32
    %c0_i32_1 = arith.constant 0 : i32
    return %c0_i32, %c0_i32_0 : i32, i32
  }
  func.func @transform_3(%arg0: i32) -> (i32, i32) {
    %c0_i32 = arith.constant 0 : i32
    %c0_i32_0 = arith.constant 0 : i32
    %c0_i32_1 = arith.constant 0 : i32
    return %c0_i32, %c0_i32_0 : i32, i32
  }
  func.func @transform_4(%arg0: i32) -> (i32, i32, i32) {
    %c0_i32 = arith.constant 0 : i32
    %c0_i32_0 = arith.constant 0 : i32
    %c0_i32_1 = arith.constant 0 : i32
    %c0_i32_2 = arith.constant 0 : i32
    return %c0_i32, %c0_i32_0, %c0_i32_1 : i32, i32, i32
  }
  func.func @transform_5(%arg0: i32) -> (i32, i32) {
    %c0_i32 = arith.constant 0 : i32
    %c0_i32_0 = arith.constant 0 : i32
    %c0_i32_1 = arith.constant 0 : i32
    return %c0_i32, %c0_i32_0 : i32, i32
  }
  func.func @transform_6(%arg0: i32) -> (i32, i32) {
    %c0_i32 = arith.constant 0 : i32
    %c0_i32_0 = arith.constant 0 : i32
    %c0_i32_1 = arith.constant 0 : i32
    return %c0_i32, %c0_i32_0 : i32, i32
  }
  func.func @transform_7(%arg0: i32) -> (i32, i32) {
    %c0_i32 = arith.constant 0 : i32
    %c0_i32_0 = arith.constant 0 : i32
    %c0_i32_1 = arith.constant 0 : i32
    return %c0_i32, %c0_i32_0 : i32, i32
  }
  func.func @transform_8(%arg0: i32) -> (i32, i32) {
    %c0_i32 = arith.constant 0 : i32
    %c0_i32_0 = arith.constant 0 : i32
    return %arg0, %c0_i32 : i32, i32
  }
}

</mosaic_0001>

<bundles_post_ra>
// kernel: roi_box_feature_extractor.5
= control target key start
LH: loop header
LB: loop body
LE: loop exit
PB: predicated region body
PF: predicated region fallthrough
CT: control target
= control target key end

     0   :  { %s409_s0 = inlined_call_operand.vmem [shape: s32[4], index: 0, kind: input, shape index: {}]   ;;  %s410_s1 = inlined_call_operand.vmem [shape: bf16[4,8,16], index: 1, kind: input, shape index: {}]   ;;  %s411_s2 = inlined_call_operand.vmem [shape: bf16[2,16,256], index: 2, kind: input, shape index: {}]   ;;  %s412_s3 = inlined_call_operand.vmem [shape: bf16[4,8,256], index: 3, kind: output, shape index: {}]  }
   0x1   :  { %s8_s14 = sshll.u32 %s409_s0, 4  ;;  %s9_s14 = int_to_ptr.vmem [resolvable:$true] %s8_s14 }
   0x2   :  { %s342_s15 = scalar_lea.vmem %s9_s14, 16  ;;  %p347_p1 = scmp.lt.s32.totalorder %s9_s14, %s9_s14 }
   0x3   :  { %p343_p0 = scmp.ne.s32.totalorder %s9_s14, %s342_s15  ;;  %p348_p2 = scmp.lt.s32.totalorder %s342_s15, %s342_s15 }
   0x5   :  { %p349_p3 = por %p348_p2, %p347_p1 }
   0x7   :  { %p350_p4 = pnand %p349_p3, %p343_p0 }
   0x9   :  { %353 = shalt.err (!%p350_p4)  }
   0xa   :  { %s364_s16 = smov [#allocation3]  }
   0xb   :  { %11 = dma.vmem_to_smem %s9_s14, 16, %s364_s16, [#allocation2] }
   0xc   :  { %358 = dma.done.wait [#allocation2], 16 }
   0xd   :  { %359 = vsyncadd [#allocation2], 4294967280 }
   0xe   :  { %13 = sfence }
   0xf   :  { %s389_s17 = smov 0  }
  0x10 LB: > { %s310_s0 = sadd.s32 4294967295, %s362_s17   ;;  %p314_p5 = scmp.ge.s32.totalorder %s362_s17, 1  ;;  %s362_s17 = sphi %s389_s17, %s19_s17  }
  0x11   : > { %p132_p6 = scmp.lt.s32.totalorder %s362_s17, 5 }
  0x13   : > { %p133_p7 = pnand %p314_p5, %p132_p6 }
  0x14   : > { %s163_s18 = sld [smem:[#allocation3 + %s310_s0]] (!%p133_p7)  ;;  %v365_v0 = vmov (!%p133_p7), 0   ;;  %p159_p8 = scmp.lt.s32.totalorder (!%p133_p7), %s310_s0, 3  ;;  %vm189_vm0 = vcmask (!%p133_p7), 130048  }
  0x15   : > { %136 = sbr.rel (%p133_p7) target bundleno = 252 (0xfc), region = 28  ;;  %225 = vmatprep.mubr.bf16.mxu0 (!%p133_p7), %v365_v0 }
  0x1a   : > { %p164_p9 = scmp.lt.s32.totalorder (!%p133_p7), %s163_s18, 1 }
  0x1c   : > { %s414_s0 = smov (!%p159_p8, %s310_s0), 3  ;;  %s416_s18 = smov (!%p164_p9, %s163_s18), 1 }
  0x1d   : > { %s315_s19 = sshll.u32 %s414_s0, 2  ;;  %s326_s20 = sshll.u32 %s416_s18, 4 }
  0x1e   : > { %s168_s23 = scalar_lea.vmem %s411_s2, %s326_s20  ;;  %s162_s26 = scalar_lea.vmem %s410_s1, %s315_s19 }
  0x1f   : > { %v339_v1 = vld [vmem:[%s168_s23 + $0x4] ss:$8 sps:$4 sm:$0xff]   ;;  %v341_v2 = vld [vmem:[%s168_s23] ss:$8 sps:$4 sm:$0xff]   ;;  %s327_s27 = sshll.u32 %s414_s0, 3 }
  0x20   : > { %193 = vmatprep.subr.bf16.mxu0 %v339_v1  ;;  %v176_v3 = vld [vmem:[%s162_s26] sm:$0xf]  ;;  %s174_s30 = scalar_lea.vmem %s412_s3, %s327_s27 }
  0x21   : > { %194 = vmatpush1.bf16.msra.mxu0 %v341_v2 }
  0x24   : > { %322 = vmatmul.mubr.msk.bf16.vlgmr.msra.gmra.mrb[0].mxu0 %vm189_vm0, %v176_v3 }
  0xf7   : > { %v227_v4 = vpop.f32.mrb[0].mxu0 }
  0xf8   : > { %v229_v5 = vpop.f32.mrb[1].mxu0 }
  0xf9   : > { %v328_v6 = vpack.c.bf16 %v229_v5, %v227_v4  ;;  %v231_v7 = vpop.f32.mrb[2].mxu0 }
  0xfa   : > { %v232_v8 = vpop.f32.mrb[3].mxu0 }
  0xfb   : > { %242 = vst [vmem:[%s174_s30] sm:$0xff] %v328_v6 }
  0xfc PF: > { %s19_s17 = sadd.s32 1, %s362_s17  }
  0xfd   : > { %p16_p10 = scmp.ge.s32.totalorder %s19_s17, 6  }
  0xff   :  { %18 = sbr.rel (!%p16_p10) target bundleno = 16 (0x10), region = 61 }

// kernel: roi_box_feature_extractor.6
= control target key start
LH: loop header
LB: loop body
LE: loop exit
PB: predicated region body
PF: predicated region fallthrough
CT: control target
= control target key end

     0   :  { %s807_s9 = smov 0   ;;  %s876_s0 = inlined_call_operand.vmem [shape: bf16[4,8,16], index: 0, kind: input, shape index: {}]   ;;  %s877_s1 = inlined_call_operand.vmem [shape: bf16[4,8,16,16], index: 1, kind: input, shape index: {}]   ;;  %s878_s2 = inlined_call_operand.vmem [shape: bf16[4,8,8,16], index: 2, kind: output, shape index: {}]  }
   0x1 LB: > { %s649_s10 = sadd.s32 4294967295, %s788_s9   ;;  %p653_p0 = scmp.ge.s32.totalorder %s788_s9, 1  ;;  %s788_s9 = sphi %s807_s9, %s12_s9  }
   0x2   : > { %p121_p1 = scmp.lt.s32.totalorder %s788_s9, 5 }
   0x4   : > { %p122_p2 = pnand %p653_p0, %p121_p1 }
   0x5   : > { %p147_p3 = scmp.lt.s32.totalorder (!%p122_p2), %s649_s10, 3  ;;  %v790_v0 = vmov (!%p122_p2), 0.0   ;;  %vm791_vm0 = vmmov (!%p122_p2), 0   ;;  %vm171_vm1 = vcmask (!%p122_p2), 130048   ;;  %vm216_vm2 = vcmask (!%p122_p2), 125952  }
   0x6   : > { %125 = sbr.rel (%p122_p2) target bundleno = 259 (0x103), region = 28  ;;  %716 = vmatprep.subr.bf16.mxu0 (!%p122_p2), %v790_v0  ;;  %722 = vmatprep.subr.bf16.mxu1 (!%p122_p2), %v790_v0 }
   0x7   : > { %718 = vmatprep.mubr.msk.bf16.mxu0 (!%p122_p2), %vm791_vm0, %v790_v0  ;;  %724 = vmatprep.mubr.msk.bf16.mxu1 (!%p122_p2), %vm791_vm0, %v790_v0 }
   0xd   : > { %s880_s10 = smov (!%p147_p3, %s649_s10), 3 }
   0xe   : > { %s698_s11 = sshll.u32 %s880_s10, 6  ;;  %s654_s12 = sshll.u32 %s880_s10, 2 }
   0xf   : > { %s824_s15 = scalar_lea.vmem %s877_s1, %s698_s11  ;;  %s150_s18 = scalar_lea.vmem %s876_s0, %s654_s12 }
  0x10   : > { %v774_v1 = vld [vmem:[%s824_s15] sm:$0xff]   ;;  %v775_v2 = vld [vmem:[%s824_s15 + $0x8] sm:$0xff]   ;;  %v776_v4 = vld [vmem:[%s824_s15 + $0x10] sm:$0xff]   ;;  %s699_s19 = sshll.u32 %s880_s10, 5 }
  0x11   : > { %717 = vmatpush3.bf16.msra.mxu0 %v774_v1  ;;  %v162_v3 = vld [vmem:[%s150_s18] sm:$0xf]  ;;  %723 = vmatpush3.bf16.msra.mxu1 %v775_v2  ;;  %v777_v5 = vld [vmem:[%s824_s15 + $0x18] sm:$0xff]   ;;  %v779_v7 = vld [vmem:[%s824_s15 + $0x28] sm:$0xff]   ;;  %s855_s22 = scalar_lea.vmem %s878_s2, %s699_s19 }
  0x12   : > { %728 = vmatprep.subr.bf16.mxu0 %v790_v0  ;;  %734 = vmatprep.subr.bf16.mxu1 %v790_v0  ;;  %v778_v6 = vld [vmem:[%s824_s15 + $0x20] sm:$0xff]   ;;  %v780_v8 = vld [vmem:[%s824_s15 + $0x30] sm:$0xff]   ;;  %v781_v9 = vld [vmem:[%s824_s15 + $0x38] sm:$0xff]  }
  0x14   : > { %719 = vmatmul.mubr.msk.bf16.vlgmr.msra.gmra.mrb[0].mxu0 %vm171_vm1, %v162_v3  ;;  %725 = vmatmul.mubr.msk.bf16.vlgmr.msra.gmra.mrb[0].mxu1 %vm171_vm1, %v162_v3 }
  0x15   : > { %729 = vmatpush3.bf16.msra.mxu0 %v776_v4  ;;  %735 = vmatpush3.bf16.msra.mxu1 %v777_v5 }
  0x16   : > { %730 = vmatprep.mubr.msk.bf16.mxu0 %vm791_vm0, %v790_v0  ;;  %736 = vmatprep.mubr.msk.bf16.mxu1 %vm791_vm0, %v790_v0 }
  0x17   : > { %740 = vmatprep.subr.bf16.mxu0 %v790_v0  ;;  %746 = vmatprep.subr.bf16.mxu1 %v790_v0 }
  0x1c   : > { %731 = vmatmul.mubr.msk.bf16.vlgmr.msra.gmra.mrb[4].mxu0 %vm171_vm1, %v162_v3  ;;  %737 = vmatmul.mubr.msk.bf16.vlgmr.msra.gmra.mrb[4].mxu1 %vm171_vm1, %v162_v3 }
  0x1d   : > { %741 = vmatpush3.bf16.msra.mxu0 %v778_v6  ;;  %747 = vmatpush3.bf16.msra.mxu1 %v779_v7 }
  0x1e   : > { %742 = vmatprep.mubr.msk.bf16.mxu0 %vm791_vm0, %v790_v0  ;;  %748 = vmatprep.mubr.msk.bf16.mxu1 %vm791_vm0, %v790_v0 }
  0x1f   : > { %752 = vmatprep.subr.bf16.mxu0 %v790_v0  ;;  %758 = vmatprep.subr.bf16.mxu1 %v790_v0 }
  0x24   : > { %743 = vmatmul.mubr.msk.bf16.vlgmr.msra.gmra.mrb[8].mxu0 %vm171_vm1, %v162_v3  ;;  %749 = vmatmul.mubr.msk.bf16.vlgmr.msra.gmra.mrb[8].mxu1 %vm171_vm1, %v162_v3 }
  0x25   : > { %753 = vmatpush3.bf16.msra.mxu0 %v780_v8  ;;  %759 = vmatpush3.bf16.msra.mxu1 %v781_v9 }
  0x26   : > { %754 = vmatprep.mubr.msk.bf16.mxu0 %vm791_vm0, %v790_v0  ;;  %760 = vmatprep.mubr.msk.bf16.mxu1 %vm791_vm0, %v790_v0 }
  0x2c   : > { %755 = vmatmul.mubr.msk.bf16.vlgmr.msra.gmra.mrb[12].mxu0 %vm171_vm1, %v162_v3  ;;  %761 = vmatmul.mubr.msk.bf16.vlgmr.msra.gmra.mrb[12].mxu1 %vm171_vm1, %v162_v3 }
  0xe7   : > { %v209_v10 = vpop.f32.mrb[0].mxu0  ;;  %v261_v12 = vpop.f32.mrb[0].mxu1 }
  0xe8   : > { %v215_v11 = vpack.c.bf16 %v209_v10, %v209_v10  ;;  %v720_v13 = vpop.f32.mrb[1].mxu0  ;;  %v267_v14 = vpack.c.bf16 %v261_v12, %v261_v12  ;;  %v726_v15 = vpop.f32.mrb[1].mxu1 }
  0xe9   : > { %v212_v16 = vpop.f32.mrb[2].mxu0  ;;  %v264_v17 = vpop.f32.mrb[2].mxu1 }
  0xea   : > { %217 = vst.msk [vmem:[%s855_s22] sm:$0xf] %vm216_vm2, %v215_v11  ;;  %v721_v18 = vpop.f32.mrb[3].mxu0  ;;  %665 = vst.msk [vmem:[%s855_s22 + $0x4] sm:$0xf] %vm216_vm2, %v267_v14  ;;  %v727_v19 = vpop.f32.mrb[3].mxu1 }
  0xef   : > { %v313_v20 = vpop.f32.mrb[4].mxu0  ;;  %v365_v22 = vpop.f32.mrb[4].mxu1 }
  0xf0   : > { %v319_v21 = vpack.c.bf16 %v313_v20, %v313_v20  ;;  %v732_v23 = vpop.f32.mrb[5].mxu0  ;;  %v371_v24 = vpack.c.bf16 %v365_v22, %v365_v22  ;;  %v738_v25 = vpop.f32.mrb[5].mxu1 }
  0xf1   : > { %v316_v26 = vpop.f32.mrb[6].mxu0  ;;  %v368_v27 = vpop.f32.mrb[6].mxu1 }
  0xf2   : > { %670 = vst.msk [vmem:[%s855_s22 + $0x8] sm:$0xf] %vm216_vm2, %v319_v21  ;;  %v733_v28 = vpop.f32.mrb[7].mxu0  ;;  %675 = vst.msk [vmem:[%s855_s22 + $0xc] sm:$0xf] %vm216_vm2, %v371_v24  ;;  %v739_v29 = vpop.f32.mrb[7].mxu1 }
  0xf7   : > { %v417_v30 = vpop.f32.mrb[8].mxu0  ;;  %v469_v32 = vpop.f32.mrb[8].mxu1 }
  0xf8   : > { %v423_v31 = vpack.c.bf16 %v417_v30, %v417_v30  ;;  %v744_v33 = vpop.f32.mrb[9].mxu0  ;;  %v475_v34 = vpack.c.bf16 %v469_v32, %v469_v32  ;;  %v750_v35 = vpop.f32.mrb[9].mxu1 }
  0xf9   : > { %v420_v36 = vpop.f32.mrb[10].mxu0  ;;  %v472_v37 = vpop.f32.mrb[10].mxu1 }
  0xfa   : > { %680 = vst.msk [vmem:[%s855_s22 + $0x10] sm:$0xf] %vm216_vm2, %v423_v31  ;;  %v745_v38 = vpop.f32.mrb[11].mxu0  ;;  %685 = vst.msk [vmem:[%s855_s22 + $0x14] sm:$0xf] %vm216_vm2, %v475_v34  ;;  %v751_v39 = vpop.f32.mrb[11].mxu1 }
  0xff   : > { %v521_v40 = vpop.f32.mrb[12].mxu0  ;;  %v573_v42 = vpop.f32.mrb[12].mxu1 }
 0x100   : > { %v527_v41 = vpack.c.bf16 %v521_v40, %v521_v40  ;;  %v756_v43 = vpop.f32.mrb[13].mxu0  ;;  %v579_v44 = vpack.c.bf16 %v573_v42, %v573_v42  ;;  %v762_v45 = vpop.f32.mrb[13].mxu1 }
 0x101   : > { %v524_v46 = vpop.f32.mrb[14].mxu0  ;;  %v576_v47 = vpop.f32.mrb[14].mxu1 }
 0x102   : > { %690 = vst.msk [vmem:[%s855_s22 + $0x18] sm:$0xf] %vm216_vm2, %v527_v41  ;;  %v757_v48 = vpop.f32.mrb[15].mxu0  ;;  %695 = vst.msk [vmem:[%s855_s22 + $0x1c] sm:$0xf] %vm216_vm2, %v579_v44  ;;  %v763_v49 = vpop.f32.mrb[15].mxu1 }
 0x103 PF: > { %s12_s9 = sadd.s32 1, %s788_s9  }
 0x104   : > { %p9_p4 = scmp.ge.s32.totalorder %s12_s9, 6  }
 0x106   :  { %11 = sbr.rel (!%p9_p4) target bundleno = 1 (0x1), region = 75 }

// kernel: roi_box_feature_extractor.8
= control target key start
LH: loop header
LB: loop body
LE: loop exit
PB: predicated region body
PF: predicated region fallthrough
CT: control target
= control target key end

     0   :  { %s1789_s27 = smov 0   ;;  %s2133_s0 = inlined_call_operand.vmem [shape: bf16[64,32], index: 0, kind: input, shape index: {}]   ;;  %s2134_s1 = inlined_call_operand.vmem [shape: f32[9,32,1], index: 1, kind: input, shape index: {}]   ;;  %s2135_s2 = inlined_call_operand.vmem [shape: bf16[32,8], index: 2, kind: input, shape index: {}]   ;;  %s2136_s3 = inlined_call_operand.vmem [shape: f32[1,8], index: 3, kind: input, shape index: {}]   ;;  %s2137_s4 = inlined_call_operand.vmem [shape: bf16[9,8,8], index: 4, kind: input, shape index: {}]   ;;  %s2138_s5 = inlined_call_operand.vmem [shape: f32[1,8], index: 5, kind: input, shape index: {}]   ;;  %s2139_s6 = inlined_call_operand.vmem [shape: bf16[8,32], index: 6, kind: input, shape index: {}]   ;;  %s2140_s7 = inlined_call_operand.vmem [shape: f32[1,32], index: 7, kind: input, shape index: {}]   ;;  %s2141_s8 = inlined_call_operand.vmem [shape: bf16[64,32], index: 8, kind: output, shape index: {}]  }
   0x1 LB: > { %s1518_s28 = sadd.s32 4294967295, %s1741_s27   ;;  %p1522_p0 = scmp.ge.s32.totalorder %s1741_s27, 1  ;;  %s1741_s27 = sphi %s1789_s27, %s18_s27  }
   0x2   : > { %p263_p1 = scmp.lt.s32.totalorder %s1741_s27, 3 }
   0x4   : > { %p264_p2 = pnand %p1522_p0, %p263_p1 }
   0x5   : > { %v1729_v0 = vld [vmem:[%s2135_s2] sm:$0xff] (!%p264_p2)   ;;  %s1523_s9 = sshll.u32 (!%p264_p2), %s1518_s28, 2  ;;  %v1730_v1 = vld [vmem:[%s2135_s2 + $0x8] sm:$0xff] (!%p264_p2)   ;;  %vm347_vm0 = vcmask (!%p264_p2), 261120   ;;  %v1743_v4 = vmov (!%p264_p2), 0   ;;  %v497_v9 = vld [vmem:[%s2134_s1 + $0x18] sm:$0xff] (!%p264_p2) }
   0x6   : > { %267 = sbr.rel (%p264_p2) target bundleno = 731 (0x2db), region = 52  ;;  %p298_p3 = scmp.lt.s32.totalorder (!%p264_p2), %s1523_s9, 7  ;;  %1640 = vmatprep.subr.bf16.mxu0 (!%p264_p2), %v1729_v0  ;;  %1728 = vset.pattern.permute.xlu1 (!%p264_p2), %v1743_v4  ;;  %v1539_v5 = vld [vmem:[%s2134_s1 + $0x20] sm:$0xff] (!%p264_p2)  ;;  %v1540_v7 = vld [vmem:[%s2134_s1 + $0x28] sm:$0xff] (!%p264_p2)  ;;  %v496_v10 = vld [vmem:[%s2134_s1 + $0x10] sm:$0xff] (!%p264_p2)  ;;  %vm441_vm1 = vcmask (!%p264_p2), 1043456  }
   0x7   : > { %1641 = vmatpush3.bf16.msra.mxu0 (!%p264_p2), %v1729_v0  ;;  %1727 = vset.pattern.permute.xlu0 (!%p264_p2), %v1743_v4  ;;  %v494_v6 = vld [vmem:[%s2134_s1] sm:$0xff] (!%p264_p2)  ;;  %v495_v8 = vld [vmem:[%s2134_s1 + $0x8] sm:$0xff] (!%p264_p2)  ;;  %v1542_v13 = vld [vmem:[%s2134_s1 + $0x38] sm:$0xff] (!%p264_p2)  ;;  %vm409_vm2 = vsmask.f32 (!%p264_p2), 2304  ;;  %vm429_vm3 = vcmask (!%p264_p2), 1042432  }
   0x8   : > { %1642 = vmatprep.subr.bf16.mxu0 (!%p264_p2), %v1730_v1  ;;  %612 = vperm.xlu1 (!%p264_p2), %1728, %v1539_v5   ;;  %v433_v11 = vld [vmem:[%s2137_s4] sm:$0xf] (!%p264_p2)  ;;  %v1541_v14 = vld [vmem:[%s2134_s1 + $0x30] sm:$0xff] (!%p264_p2)  ;;  %v1543_v15 = vld [vmem:[%s2137_s4 + $0x8] sm:$0xf] (!%p264_p2)  ;;  %vm434_vm5 = vcmask (!%p264_p2), 64512  }
   0x9   : > { %500 = vperm.xlu0 (!%p264_p2), %1727, %v494_v6   ;;  %1708 = vmatprep.subr.msk.bf16.mxu1 (!%p264_p2), %vm441_vm1, %v433_v11  ;;  %v443_v12 = vsel (!%p264_p2), %vm441_vm1, %v433_v11, 0  ;;  %v1852_v16 = vld [vmem:[%s2137_s4 + $0x4] sm:$0xf] (!%p264_p2)  ;;  %v655_v17 = vsel (!%p264_p2), %vm441_vm1, %v1543_v15, 0  ;;  %v1547_v18 = vld [vmem:[%s2134_s1 + $0x48] sm:$0xff] (!%p264_p2)  ;;  %v1549_v20 = vld [vmem:[%s2134_s1 + $0x58] sm:$0xff] (!%p264_p2) }
   0xa   : > { %1649 = vmatpush3.bf16.msra.mxu1 (!%p264_p2), %v443_v12  ;;  %v1546_v19 = vld [vmem:[%s2134_s1 + $0x40] sm:$0xff] (!%p264_p2)  ;;  %v1548_v21 = vld [vmem:[%s2134_s1 + $0x50] sm:$0xff] (!%p264_p2)  ;;  %v1554_v23 = vld [vmem:[%s2134_s1 + $0x68] sm:$0xff] (!%p264_p2)  ;;  %v554_v12 = vsel (!%p264_p2), %vm441_vm1, %v1852_v16, 0  ;;  %vm642_vm6 = vcmask (!%p264_p2), 1046528   ;;  %vm741_vm9 = vcmask (!%p264_p2), 1045504  }
   0xb   : > { %1643 = vmatpush3.bf16.msra.mxu0 (!%p264_p2), %v1730_v1  ;;  %1709 = vmatprep.subr.msk.bf16.mxu1 (!%p264_p2), %vm441_vm1, %v1852_v16  ;;  %v1873_v22 = vld [vmem:[%s2137_s4 + $0x10] sm:$0xf] (!%p264_p2)  ;;  %v1553_v24 = vld [vmem:[%s2134_s1 + $0x60] sm:$0xff] (!%p264_p2)  ;;  %v1556_v25 = vld [vmem:[%s2134_s1 + $0x78] sm:$0xff] (!%p264_p2)  ;;  %vm528_vm7 = vsmask.f32 (!%p264_p2), 7424 }
   0xc   : > { %617 = vperm.xlu1 (!%p264_p2), %1728, %v1540_v7   ;;  %1710 = vmatprep.subr.msk.bf16.mxu0 (!%p264_p2), %vm441_vm1, %v1543_v15  ;;  %v1555_v26 = vld [vmem:[%s2134_s1 + $0x70] sm:$0xff] (!%p264_p2)  ;;  %v1561_v27 = vld [vmem:[%s2134_s1 + $0x88] sm:$0xff] (!%p264_p2)  ;;  %v1560_v28 = vld [vmem:[%s2134_s1 + $0x80] sm:$0xff] (!%p264_p2)  ;;  %vm840_vm8 = vsmask.f32 (!%p264_p2), 5376  ;;  %vm947_vm10 = vcmask (!%p264_p2), 1044480  }
   0xd   : > { %s2145_s9 = smov (!%p298_p3, %s1523_s9), 7  ;;  %505 = vperm.xlu0 %1727, %v495_v8   ;;  %v1563_v29 = vld [vmem:[%s2134_s1 + $0x98] sm:$0xff]  ;;  %v1562_v30 = vld [vmem:[%s2134_s1 + $0x90] sm:$0xff]  ;;  %v1568_v31 = vld [vmem:[%s2134_s1 + $0xa8] sm:$0xff]  ;;  %vm1145_vm11 = vsmask.f32 3328 }
   0xe   : > { %s1524_s12 = sshll.u32 %s2145_s9, 2  ;;  %v1567_v32 = vld [vmem:[%s2134_s1 + $0xa0] sm:$0xff]  ;;  %v1570_v33 = vld [vmem:[%s2134_s1 + $0xb8] sm:$0xff]  ;;  %v1569_v34 = vld [vmem:[%s2134_s1 + $0xb0] sm:$0xff]  ;;  %vm1457_vm12 = vcmask 257024  }
   0xf   : > { %s301_s15 = scalar_lea.vmem %s2133_s0, %s1524_s12  ;;  %v1575_v35 = vld [vmem:[%s2134_s1 + $0xc8] sm:$0xff]  ;;  %v1574_v36 = vld [vmem:[%s2134_s1 + $0xc0] sm:$0xff]  ;;  %v1577_v37 = vld [vmem:[%s2134_s1 + $0xd8] sm:$0xff]  ;;  %s307_s21 = scalar_lea.vmem %s2141_s8, %s1524_s12 }
  0x10   : > { %v1811_v2 = vld [vmem:[%s301_s15] sm:$0xff]   ;;  %v1813_v3 = vld [vmem:[%s301_s15 + $0x8] sm:$0xff]   ;;  %515 = vperm.xlu1 %1728, %v497_v9   ;;  %v1576_v38 = vld [vmem:[%s2134_s1 + $0xd0] sm:$0xff] }
  0x11   : > { %1644 = vmatprep.mubr.msk.bf16.mxu0 %vm347_vm0, %v1811_v2  ;;  %510 = vperm.xlu0 %1727, %v496_v10   ;;  %v1582_v39 = vld [vmem:[%s2134_s1 + $0xe8] sm:$0xff]  ;;  %v1581_v40 = vld [vmem:[%s2134_s1 + $0xe0] sm:$0xff]  ;;  %v1584_v41 = vld [vmem:[%s2134_s1 + $0xf8] sm:$0xff] }
  0x12   : > { %1645 = vmatmul.mubr.msk.bf16.vlgmr.msra.gmra.mrb[0].mxu0 %vm347_vm0, %v1813_v3  ;;  %v1583_v42 = vld [vmem:[%s2134_s1 + $0xf0] sm:$0xff]  ;;  %v1589_v43 = vld [vmem:[%s2134_s1 + $0x108] sm:$0xff]  ;;  %v1588_v44 = vld [vmem:[%s2134_s1 + $0x100] sm:$0xff] }
  0x13   : > { %1661 = vmatpush3.bf16.msra.mxu0 %v655_v17  ;;  %v1591_v45 = vld [vmem:[%s2134_s1 + $0x118] sm:$0xff]  ;;  %v1590_v46 = vld [vmem:[%s2134_s1 + $0x110] sm:$0xff]  ;;  %v1527_v47 = vld [vmem:[%s2136_s3] ss:$0 sm:$0xff]  ;;  %v861_v17 = vsel %vm441_vm1, %v1873_v22, 0 }
  0x14   : > { %627 = vperm.xlu1 %1728, %v1542_v13   ;;  %1712 = vmatprep.subr.msk.bf16.mxu0 %vm441_vm1, %v1873_v22  ;;  %vm1954_vm4 = vmand %vm429_vm3, %vm409_vm2  ;;  %v1550_v9 = vld [vmem:[%s2137_s4 + $0xc] sm:$0xf]  ;;  %v1571_v10 = vld [vmem:[%s2137_s4 + $0x18] sm:$0xf] }
  0x15   : > { %622 = vperm.xlu0 %1727, %v1541_v14   ;;  %v754_v15 = vsel %vm441_vm1, %v1550_v9, 0  ;;  %v1585_v6 = vld [vmem:[%s2137_s4 + $0x20] sm:$0xf] }
  0x18   : > { %718 = vperm.xlu1 %1728, %v1547_v18   ;;  %v1974_v18 = vsel %vm441_vm1, %v1571_v10, 0 }
  0x19   : > { %713 = vperm.xlu0 %1727, %v1546_v19  }
  0x1c   : > { %728 = vperm.xlu1 %1728, %v1549_v20  }
  0x1d   : > { %723 = vperm.xlu0 %1727, %v1548_v21  }
  0x20   : > { %817 = vperm.xlu1 %1728, %v1554_v23  }
  0x21   : > { %812 = vperm.xlu0 %1727, %v1553_v24  }
  0x24   : > { %827 = vperm.xlu1 %1728, %v1556_v25  }
  0x25   : > { %822 = vperm.xlu0 %1727, %v1555_v26  }
  0x28   : > { %924 = vperm.xlu1 %1728, %v1561_v27  }
  0x29   : > { %919 = vperm.xlu0 %1727, %v1560_v28  }
  0x2c   : > { %934 = vperm.xlu1 %1728, %v1563_v29  }
  0x2d   : > { %929 = vperm.xlu0 %1727, %v1562_v30  }
  0x30   : > { %1023 = vperm.xlu1 %1728, %v1568_v31  }
  0x31   : > { %1018 = vperm.xlu0 %1727, %v1567_v32  }
  0x34   : > { %1033 = vperm.xlu1 %1728, %v1570_v33  }
  0x35   : > { %1028 = vperm.xlu0 %1727, %v1569_v34  }
  0x38   : > { %1122 = vperm.xlu1 %1728, %v1575_v35  }
  0x39   : > { %1117 = vperm.xlu0 %1727, %v1574_v36  }
  0x3c   : > { %1132 = vperm.xlu1 %1728, %v1577_v37  }
  0x3d   : > { %1127 = vperm.xlu0 %1727, %v1576_v38  }
  0x40   : > { %1227 = vperm.xlu1 %1728, %v1582_v39  }
  0x41   : > { %1222 = vperm.xlu0 %1727, %v1581_v40  }
  0x44   : > { %1237 = vperm.xlu1 %1728, %v1584_v41  }
  0x45   : > { %1232 = vperm.xlu0 %1727, %v1583_v42  }
  0x48   : > { %1325 = vperm.xlu1 %1728, %v1589_v43  }
  0x49   : > { %1320 = vperm.xlu0 %1727, %v1588_v44  }
  0x4c   : > { %1335 = vperm.xlu1 %1728, %v1591_v45  }
  0x4d   : > { %1330 = vperm.xlu0 %1727, %v1590_v46  }
  0xe5   : > { %v1646_v48 = vpop.f32.mrb[0].mxu0 }
  0xe6   : > { %v397_v49 = vadd.f32 %v1646_v48, %v1527_v47  ;;  %v388_v50 = vpop.f32.mrb[1].mxu0 }
  0xe7   : > { %v389_v51 = vadd.f32 %v1527_v47, %v388_v50  ;;  %v1647_v52 = vpop.f32.mrb[2].mxu0 }
  0xe8   : > { %v400_v53 = vadd.f32 %v1647_v52, %v1527_v47  ;;  %v391_v54 = vpop.f32.mrb[3].mxu0  ;;  %v405_v56 = vmax.f32 %v397_v49, 0.0 }
  0xe9   : > { %v392_v55 = vadd.f32 %v1527_v47, %v391_v54  ;;  %v403_v58 = vmax.f32 %v389_v51, 0.0 }
  0xea   : > { %v406_v57 = vmax.f32 %v400_v53, 0.0 }
  0xeb   : > { %v404_v59 = vmax.f32 %v392_v55, 0.0 }
  0xec   : > { %v408_v60 = vpack.c.bf16 %v406_v57, %v405_v56  ;;  %v1564_v56 = vld [vmem:[%s2137_s4 + $0x14] sm:$0xf] }
  0xed   : > { %v407_v61 = vpack.c.bf16 %v404_v59, %v403_v58 }
  0xee   : > { %v419_v62 = vshrl.u32 %v408_v60, 16  ;;  %v422_v63 = vshll.u32 %v408_v60, 16 }
  0xef   : > { %v411_v0 = vshrl.u32 %v407_v61, 16  ;;  %v414_v1 = vshll.u32 %v407_v61, 16 }
  0xf0   : > { %v421_v4 = vrot.slane %v419_v62, 5  ;;  %v424_v5 = vrot.slane %v422_v63, 6 }
  0xf1   : > { %v413_v7 = vrot.slane %v411_v0, 5  ;;  %v416_v8 = vrot.slane %v414_v1, 6 }
  0xf2   : > { %v425_v11 = vor.u32 %v424_v5, %v421_v4 }
  0xf3   : > { %v417_v13 = vor.u32 %v416_v8, %v413_v7 }
  0xf4   : > { %v1968_v14 = vsel %vm1954_vm4, %v425_v11, 0 }
  0xf5   : > { %v1977_v19 = vsel %vm409_vm2, %v417_v13, %v425_v11  ;;  %v1981_v16 = vsel %vm1954_vm4, 0, %v417_v13  ;;  %v646_v20 = vrot.slane %v1968_v14, 1  ;;  %v1985_v21 = vshll.u32 %v1968_v14, 16 }
  0xf6   : > { %1650 = vmatprep.mubr.msk.bf16.mxu1 %vm434_vm5, %v1981_v16  ;;  %v643_v22 = vrot.slane %v1981_v16, 1  ;;  %v644_v23 = vrot.slane %v1977_v19, 1  ;;  %v1992_v24 = vshrl.u32 %v1981_v16, 16  ;;  %v1995_v25 = vshll.u32 %v1981_v16, 16 }
  0xf7   : > { %1651 = vmatmul.mubr.msk.bf16.vlgmr.msra.gmra.mrb[0].mxu1 %vm434_vm5, %v1977_v19  ;;  %v2000_v26 = vshll.u32 %v1977_v19, 16  ;;  %v2003_v27 = vshrl.u32 %v1977_v19, 16  ;;  %v545_v28 = vrot.slane %v1985_v21, 1  ;;  %v742_v29 = vrot.slane %v1981_v16, 2 }
  0xf8   : > { %1655 = vmatpush3.bf16.msra.mxu1 %v554_v12  ;;  %v645_v30 = vsel %vm642_vm6, %v643_v22, %v644_v23  ;;  %v647_v31 = vsel %vm642_vm6, %v644_v23, %v646_v20  ;;  %v533_v32 = vrot.slane %v1995_v25, 1  ;;  %v841_v33 = vrot.slane %v1992_v24, 2 }
  0xf9   : > { %1662 = vmatprep.mubr.msk.bf16.mxu0 %vm434_vm5, %v645_v30  ;;  %v537_v34 = vrot.slane %v2000_v26, 1  ;;  %v842_v35 = vrot.slane %v1995_v25, 3  ;;  %v844_v36 = vrot.slane %v2003_v27, 2  ;;  %v845_v37 = vrot.slane %v2000_v26, 3  ;;  %1711 = vmatprep.subr.msk.bf16.mxu1 %vm441_vm1, %v1550_v9 }
  0xfa   : > { %1663 = vmatmul.mubr.msk.bf16.vlgmr.msra.gmra.mrb[4].mxu0 %vm434_vm5, %v647_v31  ;;  %v534_v38 = vor.u32 %v533_v32, %v1992_v24  ;;  %v743_v39 = vrot.slane %v1977_v19, 2  ;;  %v848_v40 = vshrl.u32 %v1968_v14, 16  ;;  %v851_v41 = vrot.slane %v1985_v21, 3 }
  0xfb   : > { %v541_v42 = vor.u32 %v2003_v27, %v537_v34  ;;  %v843_v43 = vor.u32 %v842_v35, %v841_v33  ;;  %v846_v44 = vor.u32 %v845_v37, %v844_v36  ;;  %1673 = vmatpush3.bf16.msra.mxu0 %v861_v17  ;;  %v1047_v45 = vrot.slane %v1981_v16, 4 }
  0xfc   : > { %v538_v46 = vsel %vm528_vm7, %v534_v38, %v537_v34  ;;  %v744_v47 = vsel %vm741_vm9, %v742_v29, %v743_v39  ;;  %v850_v48 = vrot.slane %v848_v40, 2  ;;  %v1048_v49 = vrot.slane %v1977_v19, 4  ;;  %1714 = vmatprep.subr.msk.bf16.mxu0 %vm441_vm1, %v1571_v10 }
  0xfd   : > { %1656 = vmatprep.mubr.msk.bf16.mxu1 %vm434_vm5, %v538_v46  ;;  %v847_v50 = vsel %vm840_vm8, %v843_v43, %v846_v44  ;;  %v546_v51 = vsel %vm528_vm7, %v541_v42, %v545_v28  ;;  %v745_v52 = vrot.slane %v1968_v14, 2  ;;  %v948_v53 = vrot.slane %v1981_v16, 3 }
  0xfe   : > { %1674 = vmatprep.mubr.msk.bf16.mxu0 %vm434_vm5, %v847_v50  ;;  %v852_v54 = vor.u32 %v851_v41, %v850_v48  ;;  %v1049_v55 = vsel %vm441_vm1, %v1047_v45, %v1048_v49  ;;  %v949_v57 = vrot.slane %v1977_v19, 3  ;;  %v1050_v58 = vrot.slane %v1968_v14, 4 }
  0xff   : > { %1657 = vmatmul.mubr.msk.bf16.vlgmr.msra.gmra.mrb[4].mxu1 %vm434_vm5, %v546_v51  ;;  %v746_v59 = vsel %vm741_vm9, %v743_v39, %v745_v52  ;;  %v1250_v60 = vrot.slane %v1981_v16, 5  ;;  %v1251_v61 = vrot.slane %v1977_v19, 5  ;;  %v951_v62 = vrot.slane %v1968_v14, 3 }
 0x100   : > { %1667 = vmatpush3.bf16.msra.mxu1 %v754_v15  ;;  %1668 = vmatprep.mubr.msk.bf16.mxu1 %vm434_vm5, %v744_v47  ;;  %v853_v63 = vsel %vm840_vm8, %v846_v44, %v852_v54  ;;  %v950_v0 = vsel %vm947_vm10, %v948_v53, %v949_v57  ;;  %v1051_v1 = vsel %vm441_vm1, %v1048_v49, %v1050_v58  ;;  %v1146_v4 = vrot.slane %v1992_v24, 4  ;;  %v1363_v24 = vld [vmem:[%s2139_s6] sm:$0xf] }
 0x101   : > { %1713 = vmatprep.subr.msk.bf16.mxu1 %vm441_vm1, %v1564_v56  ;;  %v1252_v5 = vsel %vm429_vm3, %v1250_v60, %v1251_v61  ;;  %v952_v7 = vsel %vm947_vm10, %v949_v57, %v951_v62  ;;  %v1147_v8 = vrot.slane %v1995_v25, 5  ;;  %v1149_v9 = vrot.slane %v2003_v27, 4  ;;  %v613_v27 = vpop.permute.xlu1 %612 }
 0x102   : > { %1675 = vmatmul.mubr.msk.bf16.vlgmr.msra.gmra.mrb[8].mxu0 %vm434_vm5, %v853_v63  ;;  %v1150_v10 = vrot.slane %v2000_v26, 5  ;;  %v1253_v11 = vrot.slane %v1968_v14, 5  ;;  %v1153_v12 = vrot.slane %v848_v40, 4  ;;  %v1154_v13 = vrot.slane %v1985_v21, 5  ;;  %v1578_v14 = vld [vmem:[%s2137_s4 + $0x1c] sm:$0xf]  ;;  %v501_v26 = vpop.permute.xlu0 %500 }
 0x103   : > { %1686 = vmatprep.mubr.msk.bf16.mxu0 %vm434_vm5, %v1049_v55  ;;  %1685 = vmatpush3.bf16.msra.mxu0 %v1974_v18  ;;  %v1148_v15 = vor.u32 %v1147_v8, %v1146_v4  ;;  %v960_v20 = vsel %vm441_vm1, %v1564_v56, 0  ;;  %v1262_v18 = vsel %vm441_vm1, %v1585_v6, 0  ;;  %v1164_v23 = vsel %vm441_vm1, %v1578_v14, 0 }
 0x104   : > { %1716 = vmatprep.subr.msk.bf16.mxu0 %vm441_vm1, %v1585_v6  ;;  %v1151_v17 = vor.u32 %v1150_v10, %v1149_v9  ;;  %v1254_v19 = vsel %vm429_vm3, %v1251_v61, %v1253_v11  ;;  %v1155_v16 = vor.u32 %v1154_v13, %v1153_v12  ;;  %v1378_v25 = vsel %vm441_vm1, %v1363_v24, 0 }
 0x105   : > { %v618_v29 = vpop.permute.xlu1 %617 }
 0x106   : > { %v1152_v22 = vsel %vm1145_vm11, %v1148_v15, %v1151_v17  ;;  %v1156_v21 = vsel %vm1145_vm11, %v1151_v17, %v1155_v16  ;;  %v506_v28 = vpop.permute.xlu0 %505 }
 0x107   : > { %1669 = vmatmul.mubr.msk.bf16.vlgmr.msra.gmra.mrb[8].mxu1 %vm434_vm5, %v746_v59 }
 0x108   : > { %1679 = vmatpush3.bf16.msra.mxu1 %v960_v20  ;;  %1680 = vmatprep.mubr.msk.bf16.mxu1 %vm434_vm5, %v950_v0 }
 0x109   : > { %1715 = vmatprep.subr.msk.bf16.mxu1 %vm441_vm1, %v1578_v14  ;;  %v516_v31 = vpop.permute.xlu1 %515 }
 0x10a   : > { %1687 = vmatmul.mubr.msk.bf16.vlgmr.msra.gmra.mrb[12].mxu0 %vm434_vm5, %v1051_v1  ;;  %v511_v30 = vpop.permute.xlu0 %510 }
 0x10b   : > { %1698 = vmatprep.mubr.msk.bf16.mxu0 %vm434_vm5, %v1252_v5  ;;  %1697 = vmatpush3.bf16.msra.mxu0 %v1262_v18 }
 0x10d   : > { %v628_v33 = vpop.permute.xlu1 %627 }
 0x10e   : > { %v623_v32 = vpop.permute.xlu0 %622 }
 0x10f   : > { %1681 = vmatmul.mubr.msk.bf16.vlgmr.msra.gmra.mrb[12].mxu1 %vm434_vm5, %v952_v7 }
 0x110   : > { %1691 = vmatpush3.bf16.msra.mxu1 %v1164_v23  ;;  %1692 = vmatprep.mubr.msk.bf16.mxu1 %vm434_vm5, %v1152_v22 }
 0x111   : > { %1717 = vmatprep.subr.msk.bf16.mxu1 %vm441_vm1, %v1363_v24  ;;  %v719_v35 = vpop.permute.xlu1 %718 }
 0x112   : > { %1699 = vmatmul.mubr.msk.bf16.vlgmr.msra.gmra.mrb[16].mxu0 %vm434_vm5, %v1254_v19  ;;  %v714_v34 = vpop.permute.xlu0 %713 }
 0x115   : > { %v729_v37 = vpop.permute.xlu1 %728 }
 0x116   : > { %v724_v36 = vpop.permute.xlu0 %723 }
 0x117   : > { %1693 = vmatmul.mubr.msk.bf16.vlgmr.msra.gmra.mrb[16].mxu1 %vm434_vm5, %v1156_v21 }
 0x118   : > { %1703 = vmatpush3.bf16.msra.mxu1 %v1378_v25 }
 0x119   : > { %v2086_v39 = vpop.permute.xlu1 %817 }
 0x11a   : > { %v813_v38 = vpop.permute.xlu0 %812 }
 0x11d   : > { %v828_v41 = vpop.permute.xlu1 %827 }
 0x11e   : > { %v823_v40 = vpop.permute.xlu0 %822 }
 0x121   : > { %v2088_v43 = vpop.permute.xlu1 %924 }
 0x122   : > { %v920_v42 = vpop.permute.xlu0 %919 }
 0x125   : > { %v935_v45 = vpop.permute.xlu1 %934 }
 0x126   : > { %v930_v44 = vpop.permute.xlu0 %929 }
 0x129   : > { %v2092_v47 = vpop.permute.xlu1 %1023 }
 0x12a   : > { %v2090_v46 = vpop.permute.xlu0 %1018 }
 0x12d   : > { %v2096_v49 = vpop.permute.xlu1 %1033 }
 0x12e   : > { %v2094_v48 = vpop.permute.xlu0 %1028 }
 0x131   : > { %v2100_v58 = vpop.permute.xlu1 %1122 }
 0x132   : > { %v2098_v55 = vpop.permute.xlu0 %1117 }
 0x135   : > { %v1133_v12 = vpop.permute.xlu1 %1132 }
 0x136   : > { %v1128_v0 = vpop.permute.xlu0 %1127 }
 0x1ca   : > { %v1652_v50 = vpop.f32.mrb[0].mxu1 }
 0x1cb   : > { %v479_v51 = vpop.f32.mrb[1].mxu1  ;;  %v520_v61 = vmul.f32 %v1652_v50, %v511_v30 }
 0x1cc   : > { %v1653_v52 = vpop.f32.mrb[2].mxu1  ;;  %v518_v1 = vmul.f32 %v501_v26, %v479_v51 }
 0x1cd   : > { %v482_v53 = vpop.f32.mrb[3].mxu1  ;;  %v1664_v54 = vpop.f32.mrb[4].mxu0  ;;  %v521_v6 = vmul.f32 %v1653_v52, %v516_v31 }
 0x1ce   : > { %v691_v56 = vpop.f32.mrb[5].mxu0  ;;  %v733_v7 = vmul.f32 %v1664_v54, %v724_v36  ;;  %v519_v13 = vmul.f32 %v506_v28, %v482_v53  ;;  %v2102_v36 = vpop.permute.xlu1 %1227 }
 0x1cf   : > { %v1665_v57 = vpop.f32.mrb[6].mxu0  ;;  %v731_v15 = vmul.f32 %v714_v34, %v691_v56 }
 0x1d0   : > { %v694_v59 = vpop.f32.mrb[7].mxu0  ;;  %v734_v20 = vmul.f32 %v1665_v57, %v729_v37 }
 0x1d1   : > { %v732_v18 = vmul.f32 %v719_v35, %v694_v59 }
 0x1d2   : > { %v1658_v60 = vpop.f32.mrb[4].mxu1 }
 0x1d3   : > { %v632_v62 = vmul.f32 %v1658_v60, %v623_v32  ;;  %v590_v63 = vpop.f32.mrb[5].mxu1 }
 0x1d4   : > { %v630_v4 = vmul.f32 %v613_v27, %v590_v63  ;;  %v1659_v5 = vpop.f32.mrb[6].mxu1  ;;  %v1223_v27 = vpop.permute.xlu0 %1222 }
 0x1d5   : > { %v636_v8 = vadd.f32 %v632_v62, %v520_v61  ;;  %v633_v9 = vmul.f32 %v1659_v5, %v628_v33  ;;  %v593_v10 = vpop.f32.mrb[7].mxu1  ;;  %v1676_v11 = vpop.f32.mrb[8].mxu0 }
 0x1d6   : > { %v634_v17 = vadd.f32 %v630_v4, %v518_v1  ;;  %v631_v19 = vmul.f32 %v618_v29, %v593_v10  ;;  %v897_v16 = vpop.f32.mrb[9].mxu0  ;;  %v939_v29 = vmul.f32 %v1676_v11, %v930_v44  ;;  %v1238_v4 = vpop.permute.xlu1 %1237 }
 0x1d7   : > { %v637_v14 = vadd.f32 %v633_v9, %v521_v6  ;;  %v1677_v22 = vpop.f32.mrb[10].mxu0  ;;  %v737_v21 = vadd.f32 %v733_v7, %v636_v8  ;;  %v937_v53 = vmul.f32 %v920_v42, %v897_v16 }
 0x1d8   : > { %v635_v23 = vadd.f32 %v631_v19, %v519_v13  ;;  %v900_v24 = vpop.f32.mrb[11].mxu0  ;;  %v735_v25 = vadd.f32 %v731_v15, %v634_v17  ;;  %v940_v57 = vmul.f32 %v1677_v22, %v935_v45 }
 0x1d9   : > { %v738_v26 = vadd.f32 %v734_v20, %v637_v14  ;;  %v938_v62 = vmul.f32 %v2088_v43, %v900_v24 }
 0x1da   : > { %v1670_v30 = vpop.f32.mrb[8].mxu1  ;;  %v736_v31 = vadd.f32 %v732_v18, %v635_v23  ;;  %v1326_v22 = vpop.permute.xlu1 %1325 }
 0x1db   : > { %v832_v32 = vmul.f32 %v1670_v30, %v823_v40  ;;  %v790_v33 = vpop.f32.mrb[9].mxu1  ;;  %v1233_v40 = vpop.permute.xlu0 %1232 }
 0x1dc   : > { %v830_v28 = vmul.f32 %v813_v38, %v790_v33  ;;  %v1671_v34 = vpop.f32.mrb[10].mxu1 }
 0x1dd   : > { %v836_v50 = vadd.f32 %v832_v32, %v737_v21  ;;  %v833_v37 = vmul.f32 %v1671_v34, %v828_v41  ;;  %v793_v51 = vpop.f32.mrb[11].mxu1  ;;  %v1688_v52 = vpop.f32.mrb[12].mxu0 }
 0x1de   : > { %v834_v35 = vadd.f32 %v830_v28, %v735_v25  ;;  %v831_v54 = vmul.f32 %v2086_v39, %v793_v51  ;;  %v1095_v56 = vpop.f32.mrb[13].mxu0  ;;  %v1137_v45 = vmul.f32 %v1688_v52, %v1128_v0  ;;  %v1336_v28 = vpop.permute.xlu1 %1335 }
 0x1df   : > { %v837_v59 = vadd.f32 %v833_v37, %v738_v26  ;;  %v1689_v60 = vpop.f32.mrb[14].mxu0  ;;  %v943_v61 = vadd.f32 %v939_v29, %v836_v50  ;;  %v1321_v43 = vpop.permute.xlu0 %1320  ;;  %v1135_v13 = vmul.f32 %v2098_v55, %v1095_v56 }
 0x1e0   : > { %v835_v63 = vadd.f32 %v831_v54, %v736_v31  ;;  %v1098_v38 = vpop.f32.mrb[15].mxu0  ;;  %v941_v1 = vadd.f32 %v937_v53, %v834_v35  ;;  %v1138_v16 = vmul.f32 %v1689_v60, %v1133_v12 }
 0x1e1   : > { %v944_v44 = vadd.f32 %v940_v57, %v837_v59 }
 0x1e2   : > { %v1682_v41 = vpop.f32.mrb[12].mxu1  ;;  %v942_v5 = vadd.f32 %v938_v62, %v835_v63 }
 0x1e3   : > { %v1038_v42 = vmul.f32 %v1682_v41, %v2094_v48  ;;  %v996_v6 = vpop.f32.mrb[13].mxu1  ;;  %v1331_v55 = vpop.permute.xlu0 %1330  ;;  %v1429_v41 = vunpack.c.l.bf16 %v1811_v2 }
 0x1e4   : > { %v1036_v39 = vmul.f32 %v2090_v46, %v996_v6  ;;  %v1683_v7 = vpop.f32.mrb[14].mxu1  ;;  %v1136_v46 = vmul.f32 %v2100_v58, %v1098_v38  ;;  %v1592_v58 = vld [vmem:[%s2138_s5] ss:$0 sm:$0xff] }
 0x1e5   : > { %v1042_v8 = vadd.f32 %v1038_v42, %v943_v61  ;;  %v1039_v9 = vmul.f32 %v1683_v7, %v2096_v49  ;;  %v999_v10 = vpop.f32.mrb[15].mxu1  ;;  %v1700_v11 = vpop.f32.mrb[16].mxu0  ;;  %v1430_v7 = vunpack.c.h.bf16 %v1811_v2 }
 0x1e6   : > { %v1040_v15 = vadd.f32 %v1036_v39, %v941_v1  ;;  %v1037_v17 = vmul.f32 %v2092_v47, %v999_v10  ;;  %v1298_v19 = vpop.f32.mrb[17].mxu0  ;;  %v1340_v47 = vmul.f32 %v1700_v11, %v1331_v55  ;;  %v1432_v39 = vunpack.c.h.bf16 %v1813_v3 }
 0x1e7   : > { %v1043_v20 = vadd.f32 %v1039_v9, %v944_v44  ;;  %v1701_v48 = vpop.f32.mrb[18].mxu0  ;;  %v1141_v14 = vadd.f32 %v1137_v45, %v1042_v8  ;;  %v1338_v34 = vmul.f32 %v1321_v43, %v1298_v19 }
 0x1e8   : > { %v1041_v0 = vadd.f32 %v1037_v17, %v942_v5  ;;  %v1301_v21 = vpop.f32.mrb[19].mxu0  ;;  %v1139_v18 = vadd.f32 %v1135_v13, %v1040_v15  ;;  %v1341_v37 = vmul.f32 %v1701_v48, %v1336_v28 }
 0x1e9   : > { %v1142_v49 = vadd.f32 %v1138_v16, %v1043_v20  ;;  %v1339_v53 = vmul.f32 %v1326_v22, %v1301_v21 }
 0x1ea   : > { %v1694_v23 = vpop.f32.mrb[16].mxu1  ;;  %v1140_v24 = vadd.f32 %v1136_v46, %v1041_v0 }
 0x1eb   : > { %v1242_v25 = vmul.f32 %v1694_v23, %v1233_v40  ;;  %v1200_v26 = vpop.f32.mrb[17].mxu1 }
 0x1ec   : > { %v1240_v30 = vmul.f32 %v1223_v27, %v1200_v26  ;;  %v1695_v31 = vpop.f32.mrb[18].mxu1 }
 0x1ed   : > { %v1246_v32 = vadd.f32 %v1242_v25, %v1141_v14  ;;  %v1243_v12 = vmul.f32 %v1695_v31, %v1238_v4  ;;  %v1203_v33 = vpop.f32.mrb[19].mxu1  ;;  %v1431_v4 = vunpack.c.l.bf16 %v1813_v3 }
 0x1ee   : > { %v1244_v29 = vadd.f32 %v1240_v30, %v1139_v18  ;;  %v1241_v50 = vmul.f32 %v2102_v36, %v1203_v33  ;;  %v1593_v36 = vld [vmem:[%s2140_s7] ss:$0 sm:$0xff] }
 0x1ef   : > { %v1344_v51 = vadd.f32 %v1340_v47, %v1246_v32  ;;  %v1247_v52 = vadd.f32 %v1243_v12, %v1142_v49 }
 0x1f0   : > { %v1342_v35 = vadd.f32 %v1338_v34, %v1244_v29  ;;  %v1245_v27 = vadd.f32 %v1241_v50, %v1140_v24 }
 0x1f1   : > { %v1355_v54 = vadd.f32 %v1592_v58, %v1344_v51  ;;  %v1345_v56 = vadd.f32 %v1341_v37, %v1247_v52 }
 0x1f2   : > { %v1353_v57 = vadd.f32 %v1592_v58, %v1342_v35  ;;  %v1343_v59 = vadd.f32 %v1339_v53, %v1245_v27 }
 0x1f3   : > { %v1356_v60 = vadd.f32 %v1592_v58, %v1345_v56  ;;  %v1359_v40 = vmax.f32 %v1355_v54, 0.0 }
 0x1f4   : > { %v1354_v61 = vadd.f32 %v1592_v58, %v1343_v59  ;;  %v1357_v63 = vmax.f32 %v1353_v57, 0.0 }
 0x1f5   : > { %v1360_v62 = vmax.f32 %v1356_v60, 0.0 }
 0x1f6   : > { %v1358_v38 = vmax.f32 %v1354_v61, 0.0 }
 0x1f7   : > { %v1362_v1 = vpack.c.bf16 %v1360_v62, %v1359_v40 }
 0x1f8   : > { %v1361_v44 = vpack.c.bf16 %v1358_v38, %v1357_v63 }
 0x1fa   : > { %1704 = vmatprep.mubr.msk.bf16.mxu1 %vm434_vm5, %v1361_v44 }
 0x1fb   : > { %1705 = vmatmul.mubr.msk.bf16.vlgmr.msra.gmra.mrb[20].mxu1 %vm434_vm5, %v1362_v1 }
 0x2ce   : > { %v1706_v5 = vpop.f32.mrb[20].mxu1 }
 0x2cf   : > { %v1423_v42 = vadd.f32 %v1706_v5, %v1593_v36  ;;  %v1414_v6 = vpop.f32.mrb[21].mxu1 }
 0x2d0   : > { %v1415_v45 = vadd.f32 %v1593_v36, %v1414_v6  ;;  %v1707_v8 = vpop.f32.mrb[22].mxu1 }
 0x2d1   : > { %v1435_v9 = vadd.f32 %v1431_v4, %v1423_v42  ;;  %v1426_v10 = vadd.f32 %v1707_v8, %v1593_v36  ;;  %v1417_v11 = vpop.f32.mrb[23].mxu1 }
 0x2d2   : > { %v1433_v43 = vadd.f32 %v1429_v41, %v1415_v45  ;;  %v1418_v13 = vadd.f32 %v1593_v36, %v1417_v11 }
 0x2d3   : > { %v1436_v15 = vadd.f32 %v1432_v39, %v1426_v10  ;;  %v1439_v16 = vmax.f32 %v1435_v9, 0.0 }
 0x2d4   : > { %v1437_v17 = vmax.f32 %v1433_v43, 0.0  ;;  %v1434_v19 = vadd.f32 %v1430_v7, %v1418_v13 }
 0x2d5   : > { %v1440_v20 = vmax.f32 %v1436_v15, 0.0  ;;  %v1604_v14 = vpack.c.bf16 %v1439_v16, %v1439_v16 }
 0x2d6   : > { %v1602_v3 = vpack.c.bf16 %v1437_v17, %v1437_v17  ;;  %v1438_v2 = vmax.f32 %v1434_v19, 0.0 }
 0x2d7   : > { %v1605_v22 = vpack.c.bf16 %v1440_v20, %v1440_v20  ;;  %1460 = vst.msk [vmem:[%s307_s21 + $0x8] sm:$0xf] %vm1457_vm12, %v1604_v14 }
 0x2d8   : > { %1458 = vst.msk [vmem:[%s307_s21] sm:$0xf] %vm1457_vm12, %v1602_v3  ;;  %v1603_v48 = vpack.c.bf16 %v1438_v2, %v1438_v2 }
 0x2d9   : > { %1461 = vst.msk [vmem:[%s307_s21 + $0xc] sm:$0xf] %vm1457_vm12, %v1605_v22 }
 0x2da   : > { %1459 = vst.msk [vmem:[%s307_s21 + $0x4] sm:$0xf] %vm1457_vm12, %v1603_v48 }
 0x2db PF: > { %s18_s27 = sadd.s32 1, %s1741_s27  }
 0x2dc   : > { %p15_p4 = scmp.ge.s32.totalorder %s18_s27, 4  }
 0x2de   :  { %17 = sbr.rel (!%p15_p4) target bundleno = 1 (0x1), region = 98 }

// kernel: roi_box_feature_extractor.7
= control target key start
LH: loop header
LB: loop body
LE: loop exit
PB: predicated region body
PF: predicated region fallthrough
CT: control target
= control target key end

     0   :  { %s2155_s17 = smov 0   ;;  %s2509_s0 = inlined_call_operand.vmem [shape: bf16[256,16], index: 0, kind: input, shape index: {}]   ;;  %s2510_s1 = inlined_call_operand.vmem [shape: bf16[16,64], index: 1, kind: input, shape index: {}]   ;;  %s2511_s2 = inlined_call_operand.vmem [shape: f32[9,32,1], index: 2, kind: input, shape index: {}]   ;;  %s2512_s3 = inlined_call_operand.vmem [shape: bf16[16,8], index: 3, kind: input, shape index: {}]   ;;  %s2513_s4 = inlined_call_operand.vmem [shape: f32[1,8], index: 4, kind: input, shape index: {}]   ;;  %s2514_s5 = inlined_call_operand.vmem [shape: bf16[9,8,8], index: 5, kind: input, shape index: {}]   ;;  %s2515_s6 = inlined_call_operand.vmem [shape: f32[1,8], index: 6, kind: input, shape index: {}]   ;;  %s2516_s7 = inlined_call_operand.vmem [shape: bf16[8,32], index: 7, kind: input, shape index: {}]   ;;  %s2517_s8 = inlined_call_operand.vmem [shape: f32[1,32], index: 8, kind: input, shape index: {}]   ;;  %s2518_s9 = inlined_call_operand.vmem [shape: bf16[16,32], index: 9, kind: input, shape index: {}]   ;;  %s2519_s10 = inlined_call_operand.vmem [shape: f32[1,32], index: 10, kind: input, shape index: {}]   ;;  %s2520_s11 = inlined_call_operand.vmem [shape: bf16[64,32], index: 11, kind: output, shape index: {}]  }
   0x1 LB: > { %s1796_s18 = sadd.s32 4294967295, %s2090_s17   ;;  %p1800_p0 = scmp.ge.s32.totalorder %s2090_s17, 1  ;;  %s2090_s17 = sphi %s2155_s17, %s21_s17  }
   0x2   : > { %p338_p1 = scmp.lt.s32.totalorder %s2090_s17, 3 }
   0x4   : > { %p339_p2 = pnand %p1800_p0, %p338_p1 }
   0x5   : > { %s1801_s19 = sshll.u32 (!%p339_p2), %s1796_s18, 4  ;;  %v2092_v0 = vmov (!%p339_p2), 0.0   ;;  %vm2093_vm0 = vmmov (!%p339_p2), 0   ;;  %v2082_v9 = vld [vmem:[%s2512_s3] sm:$0xff] (!%p339_p2)   ;;  %vm430_vm1 = vcmask (!%p339_p2), 523264   ;;  %vm565_vm2 = vcmask (!%p339_p2), 130048  }
   0x6   : > { %342 = sbr.rel (%p339_p2) target bundleno = 971 (0x3cb), region = 64  ;;  %1942 = vmatprep.subr.bf16.mxu0 (!%p339_p2), %v2092_v0  ;;  %1954 = vmatprep.subr.bf16.mxu1 (!%p339_p2), %v2092_v0  ;;  %p379_p3 = scmp.lt.s32.totalorder (!%p339_p2), %s1801_s19, 31  ;;  %v2081_v10 = vld [vmem:[%s2510_s1] sm:$0xff] (!%p339_p2)   ;;  %v2094_v21 = vmov (!%p339_p2), 0   ;;  %v1826_v24 = vld [vmem:[%s2511_s2 + $0x28] sm:$0xff] (!%p339_p2)  ;;  %v715_v26 = vld [vmem:[%s2511_s2 + $0x18] sm:$0xff] (!%p339_p2) }
   0x7   : > { %1950 = vmatprep.mubr.msk.bf16.mxu0 (!%p339_p2), %vm2093_vm0, %v2092_v0  ;;  %1962 = vmatprep.mubr.msk.bf16.mxu1 (!%p339_p2), %vm2093_vm0, %v2092_v0  ;;  %v1825_v22 = vld [vmem:[%s2511_s2 + $0x20] sm:$0xff] (!%p339_p2)  ;;  %v713_v25 = vld [vmem:[%s2511_s2 + $0x8] sm:$0xff] (!%p339_p2)  ;;  %v714_v27 = vld [vmem:[%s2511_s2 + $0x10] sm:$0xff] (!%p339_p2)  ;;  %vm659_vm3 = vcmask (!%p339_p2), 1043456   ;;  %vm627_vm4 = vsmask.f32 (!%p339_p2), 2304 }
   0x8   : > { %2072 = vset.pattern.permute.xlu1 (!%p339_p2), %v2094_v21  ;;  %2071 = vset.pattern.permute.xlu0 (!%p339_p2), %v2094_v21  ;;  %v712_v23 = vld [vmem:[%s2511_s2] sm:$0xff] (!%p339_p2)  ;;  %v1828_v30 = vld [vmem:[%s2511_s2 + $0x38] sm:$0xff] (!%p339_p2)  ;;  %v1827_v31 = vld [vmem:[%s2511_s2 + $0x30] sm:$0xff] (!%p339_p2)  ;;  %vm647_vm5 = vcmask (!%p339_p2), 1042432   ;;  %vm652_vm7 = vcmask (!%p339_p2), 64512   ;;  %vm860_vm8 = vcmask (!%p339_p2), 1046528  }
   0x9   : > { %830 = vperm.xlu1 (!%p339_p2), %2072, %v1825_v22   ;;  %718 = vperm.xlu0 (!%p339_p2), %2071, %v712_v23   ;;  %v651_v28 = vld [vmem:[%s2514_s5] sm:$0xf] (!%p339_p2)  ;;  %v1822_v32 = vld [vmem:[%s2514_s5 + $0x4] sm:$0xf] (!%p339_p2)  ;;  %v2219_v34 = vld [vmem:[%s2514_s5 + $0x8] sm:$0xf] (!%p339_p2) }
   0xa   : > { %v661_v29 = vsel (!%p339_p2), %vm659_vm3, %v651_v28, 0  ;;  %v772_v33 = vsel (!%p339_p2), %vm659_vm3, %v1822_v32, 0  ;;  %v1833_v35 = vld [vmem:[%s2511_s2 + $0x48] sm:$0xff] (!%p339_p2)  ;;  %v1832_v36 = vld [vmem:[%s2511_s2 + $0x40] sm:$0xff] (!%p339_p2)  ;;  %v1835_v37 = vld [vmem:[%s2511_s2 + $0x58] sm:$0xff] (!%p339_p2)  ;;  %vm959_vm10 = vcmask (!%p339_p2), 1045504  }
   0xb   : > { %v1834_v38 = vld [vmem:[%s2511_s2 + $0x50] sm:$0xff] (!%p339_p2)  ;;  %v2238_v39 = vld [vmem:[%s2514_s5 + $0xc] sm:$0xf] (!%p339_p2)  ;;  %v1839_v41 = vld [vmem:[%s2511_s2 + $0x60] sm:$0xff] (!%p339_p2)  ;;  %vm746_vm9 = vsmask.f32 (!%p339_p2), 7424 }
   0xc   : > { %v1840_v40 = vld [vmem:[%s2511_s2 + $0x68] sm:$0xff] (!%p339_p2)  ;;  %v1842_v42 = vld [vmem:[%s2511_s2 + $0x78] sm:$0xff] (!%p339_p2)  ;;  %v1841_v43 = vld [vmem:[%s2511_s2 + $0x70] sm:$0xff] (!%p339_p2)  ;;  %vm1058_vm11 = vsmask.f32 (!%p339_p2), 5376  ;;  %vm1165_vm12 = vcmask (!%p339_p2), 1044480  }
   0xd   : > { %s2524_s19 = smov (!%p379_p3, %s1801_s19), 31  ;;  %835 = vperm.xlu1 %2072, %v1826_v24   ;;  %723 = vperm.xlu0 %2071, %v713_v25   ;;  %v1847_v44 = vld [vmem:[%s2511_s2 + $0x88] sm:$0xff]  ;;  %v1846_v45 = vld [vmem:[%s2511_s2 + $0x80] sm:$0xff]  ;;  %v1849_v46 = vld [vmem:[%s2511_s2 + $0x98] sm:$0xff]  ;;  %vm1363_vm13 = vsmask.f32 3328 }
   0xe   : > { %s1802_s20 = sshll.u32 %s2524_s19, 2  ;;  %v1848_v47 = vld [vmem:[%s2511_s2 + $0x90] sm:$0xff]  ;;  %v1854_v48 = vld [vmem:[%s2511_s2 + $0xa8] sm:$0xff]  ;;  %v1853_v49 = vld [vmem:[%s2511_s2 + $0xa0] sm:$0xff]  ;;  %s1803_s24 = sshll.u32 %s1796_s18, 2  ;;  %vm1735_vm14 = vcmask 257024  }
   0xf   : > { %s382_s23 = scalar_lea.vmem %s2509_s0, %s1802_s20  ;;  %v1856_v50 = vld [vmem:[%s2511_s2 + $0xb8] sm:$0xff]  ;;  %v1855_v51 = vld [vmem:[%s2511_s2 + $0xb0] sm:$0xff]  ;;  %v1861_v52 = vld [vmem:[%s2511_s2 + $0xc8] sm:$0xff]  ;;  %p385_p4 = scmp.lt.s32.totalorder %s1803_s24, 7 }
  0x10   : > { %v2073_v1 = vld [vmem:[%s382_s23] sm:$0xff]   ;;  %v2075_v3 = vld [vmem:[%s382_s23 + $0x8] sm:$0xff]   ;;  %v2077_v5 = vld [vmem:[%s382_s23 + $0x10] sm:$0xff]  }
  0x11   : > { %v2074_v2 = vld [vmem:[%s382_s23 + $0x20] sm:$0xff]   ;;  %1943 = vmatpush3.bf16.msra.mxu0 %v2073_v1  ;;  %v2076_v4 = vld [vmem:[%s382_s23 + $0x28] sm:$0xff]   ;;  %v2078_v6 = vld [vmem:[%s382_s23 + $0x30] sm:$0xff]   ;;  %733 = vperm.xlu1 %2072, %v715_v26   ;;  %s2526_s24 = smov (!%p385_p4, %s1803_s24), 7 }
  0x12   : > { %1955 = vmatpush3.bf16.msra.mxu1 %v2074_v2  ;;  %1944 = vmatprep.subr.bf16.mxu0 %v2092_v0  ;;  %v2079_v7 = vld [vmem:[%s382_s23 + $0x18] sm:$0xff]   ;;  %v1860_v53 = vld [vmem:[%s2511_s2 + $0xc0] sm:$0xff]  ;;  %v1862_v55 = vld [vmem:[%s2511_s2 + $0xd0] sm:$0xff]  ;;  %s1804_s18 = sshll.u32 %s2526_s24, 2 }
  0x13   : > { %1956 = vmatprep.subr.bf16.mxu1 %v2092_v0  ;;  %v2080_v8 = vld [vmem:[%s382_s23 + $0x38] sm:$0xff]   ;;  %728 = vperm.xlu0 %2071, %v714_v27   ;;  %v1868_v56 = vld [vmem:[%s2511_s2 + $0xe8] sm:$0xff]  ;;  %v1867_v57 = vld [vmem:[%s2511_s2 + $0xe0] sm:$0xff]  ;;  %s388_s12 = scalar_lea.vmem %s2520_s11, %s1804_s18 }
  0x14   : > { %v1863_v54 = vld [vmem:[%s2511_s2 + $0xd8] sm:$0xff]  ;;  %v1869_v59 = vld [vmem:[%s2511_s2 + $0xf0] sm:$0xff]  ;;  %v1875_v60 = vld [vmem:[%s2511_s2 + $0x108] sm:$0xff] }
  0x15   : > { %1945 = vmatpush3.bf16.msra.mxu0 %v2075_v3  ;;  %845 = vperm.xlu1 %2072, %v1828_v30   ;;  %v1870_v58 = vld [vmem:[%s2511_s2 + $0xf8] sm:$0xff]  ;;  %v1874_v61 = vld [vmem:[%s2511_s2 + $0x100] sm:$0xff]  ;;  %v1876_v63 = vld [vmem:[%s2511_s2 + $0x110] sm:$0xff] }
  0x16   : > { %1957 = vmatpush3.bf16.msra.mxu1 %v2076_v4  ;;  %1946 = vmatprep.subr.bf16.mxu0 %v2092_v0  ;;  %v1877_v62 = vld [vmem:[%s2511_s2 + $0x118] sm:$0xff]  ;;  %vm2319_vm6 = vmand %vm647_vm5, %vm627_vm4  ;;  %v1843_v26 = vld [vmem:[%s2514_s5 + $0x10] sm:$0xf] }
  0x17   : > { %1958 = vmatprep.subr.bf16.mxu1 %v2092_v0  ;;  %840 = vperm.xlu0 %2071, %v1827_v31   ;;  %v972_v31 = vsel %vm659_vm3, %v2238_v39, 0 }
  0x19   : > { %1947 = vmatpush3.bf16.msra.mxu0 %v2077_v5  ;;  %936 = vperm.xlu1 %2072, %v1833_v35  }
  0x1a   : > { %1959 = vmatpush3.bf16.msra.mxu1 %v2078_v6  ;;  %1948 = vmatprep.subr.bf16.mxu0 %v2092_v0 }
  0x1b   : > { %1960 = vmatprep.subr.bf16.mxu1 %v2092_v0  ;;  %931 = vperm.xlu0 %2071, %v1832_v36   ;;  %v1816_v0 = vld [vmem:[%s2513_s4] ss:$0 sm:$0xff] }
  0x1d   : > { %1949 = vmatpush3.bf16.msra.mxu0 %v2079_v7  ;;  %946 = vperm.xlu1 %2072, %v1835_v37  }
  0x1e   : > { %1961 = vmatpush3.bf16.msra.mxu1 %v2080_v8  ;;  %2051 = vmatprep.subr.msk.bf16.mxu0 %vm659_vm3, %v1822_v32  ;;  %v1079_v32 = vsel %vm659_vm3, %v1843_v26, 0 }
  0x1f   : > { %1966 = vmatprep.subr.bf16.mxu1 %v2082_v9  ;;  %941 = vperm.xlu0 %2071, %v1834_v38  }
  0x20   : > { %1951 = vmatmul.mubr.msk.bf16.vlgmr.msra.gmra.mrb[0].mxu0 %vm430_vm1, %v2081_v10 }
  0x21   : > { %1963 = vmatmul.mubr.msk.bf16.vlgmr.msra.gmra.mrb[0].mxu1 %vm430_vm1, %v2081_v10  ;;  %1979 = vmatpush3.bf16.msra.mxu0 %v772_v33 }
  0x22   : > { %1967 = vmatpush3.bf16.msra.mxu1 %v2082_v9  ;;  %2053 = vmatprep.subr.msk.bf16.mxu0 %vm659_vm3, %v2238_v39 }
  0x23   : > { %2050 = vmatprep.subr.msk.bf16.mxu1 %vm659_vm3, %v651_v28  ;;  %1035 = vperm.xlu1 %2072, %v1840_v40   ;;  %v873_v28 = vsel %vm659_vm3, %v2219_v34, 0 }
  0x24   : > { %1030 = vperm.xlu0 %2071, %v1839_v41  }
  0x27   : > { %1045 = vperm.xlu1 %2072, %v1842_v42  }
  0x28   : > { %1040 = vperm.xlu0 %2071, %v1841_v43  }
  0x2b   : > { %1142 = vperm.xlu1 %2072, %v1847_v44  }
  0x2c   : > { %1137 = vperm.xlu0 %2071, %v1846_v45  }
  0x2f   : > { %1152 = vperm.xlu1 %2072, %v1849_v46  }
  0x30   : > { %1147 = vperm.xlu0 %2071, %v1848_v47  }
  0x33   : > { %1241 = vperm.xlu1 %2072, %v1854_v48  }
  0x34   : > { %1236 = vperm.xlu0 %2071, %v1853_v49  }
  0x37   : > { %1251 = vperm.xlu1 %2072, %v1856_v50  }
  0x38   : > { %1246 = vperm.xlu0 %2071, %v1855_v51  }
  0x3b   : > { %1340 = vperm.xlu1 %2072, %v1861_v52  }
  0x3c   : > { %1335 = vperm.xlu0 %2071, %v1860_v53  }
  0x3f   : > { %1350 = vperm.xlu1 %2072, %v1863_v54  }
  0x40   : > { %1345 = vperm.xlu0 %2071, %v1862_v55  }
  0x43   : > { %1445 = vperm.xlu1 %2072, %v1868_v56  }
  0x44   : > { %1440 = vperm.xlu0 %2071, %v1867_v57  }
  0x47   : > { %1455 = vperm.xlu1 %2072, %v1870_v58  }
  0x48   : > { %1450 = vperm.xlu0 %2071, %v1869_v59  }
  0x4b   : > { %1543 = vperm.xlu1 %2072, %v1875_v60  }
  0x4c   : > { %1538 = vperm.xlu0 %2071, %v1874_v61  }
  0x4f   : > { %1553 = vperm.xlu1 %2072, %v1877_v62  }
  0x50   : > { %1548 = vperm.xlu0 %2071, %v1876_v63  }
  0xf3   : > { %v468_v11 = vpop.f32.mrb[0].mxu0 }
  0xf4   : > { %v541_v12 = vpop.f32.mrb[0].mxu1  ;;  %v1952_v13 = vpop.f32.mrb[1].mxu0 }
  0xf5   : > { %v1964_v14 = vpop.f32.mrb[1].mxu1  ;;  %v471_v15 = vpop.f32.mrb[2].mxu0 }
  0xf6   : > { %v2174_v16 = vpack.c.bf16 %v471_v15, %v468_v11  ;;  %v544_v17 = vpop.f32.mrb[2].mxu1  ;;  %v1953_v18 = vpop.f32.mrb[3].mxu0 }
  0xf7   : > { %v2176_v19 = vpack.c.bf16 %v544_v17, %v541_v12  ;;  %v1965_v20 = vpop.f32.mrb[3].mxu1 }
  0xf8   : > { %1968 = vmatprep.mubr.msk.bf16.mxu1 %vm565_vm2, %v2174_v16 }
  0xf9   : > { %1969 = vmatmul.mubr.msk.bf16.vlgmr.msra.gmra.mrb[4].mxu1 %vm565_vm2, %v2176_v19 }
  0xfa   : > { %1973 = vmatpush3.bf16.msra.mxu1 %v661_v29 }
  0xfb   : > { %2052 = vmatprep.subr.msk.bf16.mxu1 %vm659_vm3, %v2219_v34 }
 0x1cc   : > { %v1970_v1 = vpop.f32.mrb[4].mxu1 }
 0x1cd   : > { %v615_v2 = vadd.f32 %v1970_v1, %v1816_v0  ;;  %v606_v3 = vpop.f32.mrb[5].mxu1 }
 0x1ce   : > { %v607_v4 = vadd.f32 %v1816_v0, %v606_v3  ;;  %v1971_v5 = vpop.f32.mrb[6].mxu1 }
 0x1cf   : > { %v618_v6 = vadd.f32 %v1971_v5, %v1816_v0  ;;  %v609_v7 = vpop.f32.mrb[7].mxu1  ;;  %v623_v9 = vmax.f32 %v615_v2, 0.0 }
 0x1d0   : > { %v610_v8 = vadd.f32 %v1816_v0, %v609_v7  ;;  %v621_v11 = vmax.f32 %v607_v4, 0.0 }
 0x1d1   : > { %v624_v10 = vmax.f32 %v618_v6, 0.0  ;;  %v1850_v6 = vld [vmem:[%s2514_s5 + $0x14] sm:$0xf] }
 0x1d2   : > { %v622_v12 = vmax.f32 %v610_v8, 0.0 }
 0x1d3   : > { %v626_v13 = vpack.c.bf16 %v624_v10, %v623_v9 }
 0x1d4   : > { %v625_v14 = vpack.c.bf16 %v622_v12, %v621_v11  ;;  %v1857_v12 = vld [vmem:[%s2514_s5 + $0x18] sm:$0xf] }
 0x1d5   : > { %v637_v15 = vshrl.u32 %v626_v13, 16  ;;  %v640_v17 = vshll.u32 %v626_v13, 16 }
 0x1d6   : > { %v629_v18 = vshrl.u32 %v625_v14, 16  ;;  %v632_v20 = vshll.u32 %v625_v14, 16 }
 0x1d7   : > { %v639_v21 = vrot.slane %v637_v15, 5  ;;  %v642_v22 = vrot.slane %v640_v17, 6 }
 0x1d8   : > { %v631_v24 = vrot.slane %v629_v18, 5  ;;  %v634_v25 = vrot.slane %v632_v20, 6 }
 0x1d9   : > { %v643_v27 = vor.u32 %v642_v22, %v639_v21 }
 0x1da   : > { %v635_v29 = vor.u32 %v634_v25, %v631_v24 }
 0x1db   : > { %v2330_v30 = vsel %vm2319_vm6, %v643_v27, 0 }
 0x1dc   : > { %v2336_v33 = vsel %vm627_vm4, %v635_v29, %v643_v27  ;;  %v2340_v34 = vsel %vm2319_vm6, 0, %v635_v29  ;;  %v2343_v35 = vshll.u32 %v2330_v30, 16  ;;  %v864_v36 = vrot.slane %v2330_v30, 1 }
 0x1dd   : > { %1974 = vmatprep.mubr.msk.bf16.mxu1 %vm652_vm7, %v2340_v34  ;;  %v861_v37 = vrot.slane %v2340_v34, 1  ;;  %v862_v38 = vrot.slane %v2336_v33, 1  ;;  %v747_v39 = vshrl.u32 %v2340_v34, 16  ;;  %v749_v40 = vshll.u32 %v2340_v34, 16 }
 0x1de   : > { %1975 = vmatmul.mubr.msk.bf16.vlgmr.msra.gmra.mrb[8].mxu1 %vm652_vm7, %v2336_v33  ;;  %v2355_v41 = vshll.u32 %v2336_v33, 16  ;;  %v2358_v42 = vshrl.u32 %v2336_v33, 16  ;;  %v763_v43 = vrot.slane %v2343_v35, 1  ;;  %v960_v44 = vrot.slane %v2340_v34, 2 }
 0x1df   : > { %1985 = vmatpush3.bf16.msra.mxu1 %v873_v28  ;;  %v863_v45 = vsel %vm860_vm8, %v861_v37, %v862_v38  ;;  %v751_v46 = vrot.slane %v749_v40, 1  ;;  %v865_v47 = vsel %vm860_vm8, %v862_v38, %v864_v36  ;;  %v961_v48 = vrot.slane %v2336_v33, 2 }
 0x1e0   : > { %1986 = vmatprep.mubr.msk.bf16.mxu1 %vm652_vm7, %v863_v45  ;;  %v755_v49 = vrot.slane %v2355_v41, 1  ;;  %2054 = vmatprep.subr.msk.bf16.mxu1 %vm659_vm3, %v1843_v26  ;;  %v1059_v50 = vrot.slane %v747_v39, 2  ;;  %v1060_v51 = vrot.slane %v749_v40, 3  ;;  %v1062_v52 = vrot.slane %v2358_v42, 2  ;;  %v719_v45 = vpop.permute.xlu0 %718 }
 0x1e1   : > { %v752_v53 = vor.u32 %v751_v46, %v747_v39  ;;  %v962_v54 = vsel %vm959_vm10, %v960_v44, %v961_v48  ;;  %v1063_v55 = vrot.slane %v2355_v41, 3  ;;  %v963_v56 = vrot.slane %v2330_v30, 2  ;;  %v831_v44 = vpop.permute.xlu1 %830 }
 0x1e2   : > { %v759_v57 = vor.u32 %v2358_v42, %v755_v49  ;;  %v1061_v58 = vor.u32 %v1060_v51, %v1059_v50  ;;  %v1066_v59 = vshrl.u32 %v2330_v30, 16  ;;  %v1069_v60 = vrot.slane %v2343_v35, 3 }
 0x1e3   : > { %v756_v61 = vsel %vm746_vm9, %v752_v53, %v755_v49  ;;  %v1064_v62 = vor.u32 %v1063_v55, %v1062_v52  ;;  %v964_v63 = vsel %vm959_vm10, %v961_v48, %v963_v56  ;;  %v1166_v0 = vrot.slane %v2340_v34, 3 }
 0x1e4   : > { %1980 = vmatprep.mubr.msk.bf16.mxu0 %vm652_vm7, %v756_v61  ;;  %v764_v1 = vsel %vm746_vm9, %v759_v57, %v763_v43  ;;  %v1068_v2 = vrot.slane %v1066_v59, 2  ;;  %v1167_v3 = vrot.slane %v2336_v33, 3  ;;  %v1265_v4 = vrot.slane %v2340_v34, 4  ;;  %v2443_v43 = vld [vmem:[%s2518_s9] sm:$0xff]  }
 0x1e5   : > { %1981 = vmatmul.mubr.msk.bf16.vlgmr.msra.gmra.mrb[4].mxu0 %vm652_vm7, %v764_v1  ;;  %v1065_v5 = vsel %vm1058_vm11, %v1061_v58, %v1064_v62  ;;  %v1266_v7 = vrot.slane %v2336_v33, 4  ;;  %v1169_v8 = vrot.slane %v2330_v30, 3  ;;  %v1268_v9 = vrot.slane %v2330_v30, 4  ;;  %v836_v46 = vpop.permute.xlu1 %835 }
 0x1e6   : > { %1991 = vmatpush3.bf16.msra.mxu0 %v972_v31  ;;  %1987 = vmatmul.mubr.msk.bf16.vlgmr.msra.gmra.mrb[12].mxu1 %vm652_vm7, %v865_v47  ;;  %v1070_v10 = vor.u32 %v1069_v60, %v1068_v2  ;;  %v1168_v11 = vsel %vm1165_vm12, %v1166_v0, %v1167_v3  ;;  %v1364_v13 = vrot.slane %v747_v39, 4  ;;  %v1365_v14 = vrot.slane %v749_v40, 5  ;;  %v724_v47 = vpop.permute.xlu0 %723 }
 0x1e7   : > { %1992 = vmatprep.mubr.msk.bf16.mxu0 %vm652_vm7, %v962_v54  ;;  %1997 = vmatpush3.bf16.msra.mxu1 %v1079_v32  ;;  %v1267_v15 = vsel %vm659_vm3, %v1265_v4, %v1266_v7  ;;  %v1170_v17 = vsel %vm1165_vm12, %v1167_v3, %v1169_v8  ;;  %v1269_v18 = vsel %vm659_vm3, %v1266_v7, %v1268_v9  ;;  %v1367_v20 = vrot.slane %v2358_v42, 4 }
 0x1e8   : > { %1998 = vmatprep.mubr.msk.bf16.mxu1 %vm652_vm7, %v1065_v5  ;;  %2055 = vmatprep.subr.msk.bf16.mxu0 %vm659_vm3, %v1850_v6  ;;  %v1071_v21 = vsel %vm1058_vm11, %v1064_v62, %v1070_v10  ;;  %v1366_v22 = vor.u32 %v1365_v14, %v1364_v13  ;;  %v1368_v23 = vrot.slane %v2355_v41, 5  ;;  %v1468_v24 = vrot.slane %v2340_v34, 5  ;;  %v1581_v41 = vld [vmem:[%s2516_s7] sm:$0xf] }
 0x1e9   : > { %2056 = vmatprep.subr.msk.bf16.mxu1 %vm659_vm3, %v1857_v12  ;;  %v1469_v25 = vrot.slane %v2336_v33, 5  ;;  %v1371_v26 = vrot.slane %v1066_v59, 4  ;;  %v1372_v27 = vrot.slane %v2343_v35, 5  ;;  %v1471_v28 = vrot.slane %v2330_v30, 5  ;;  %v1864_v33 = vld [vmem:[%s2514_s5 + $0x1c] sm:$0xf]  ;;  %v734_v48 = vpop.permute.xlu1 %733 }
 0x1ea   : > { %v1369_v29 = vor.u32 %v1368_v23, %v1367_v20  ;;  %v1178_v31 = vsel %vm659_vm3, %v1850_v6, 0  ;;  %v1277_v38 = vsel %vm659_vm3, %v1857_v12, 0  ;;  %v1871_v35 = vld [vmem:[%s2514_s5 + $0x20] sm:$0xf]  ;;  %v1382_v39 = vsel %vm659_vm3, %v1864_v33, 0  ;;  %v729_v49 = vpop.permute.xlu0 %728 }
 0x1eb   : > { %v1470_v32 = vsel %vm647_vm5, %v1468_v24, %v1469_v25  ;;  %v1373_v36 = vor.u32 %v1372_v27, %v1371_v26  ;;  %v1472_v37 = vsel %vm647_vm5, %v1469_v25, %v1471_v28  ;;  %v1480_v40 = vsel %vm659_vm3, %v1871_v35, 0 }
 0x1ec   : > { %v1370_v34 = vsel %vm1363_vm13, %v1366_v22, %v1369_v29  ;;  %v1596_v42 = vsel %vm659_vm3, %v1581_v41, 0 }
 0x1ed   : > { %1993 = vmatmul.mubr.msk.bf16.vlgmr.msra.gmra.mrb[8].mxu0 %vm652_vm7, %v964_v63  ;;  %v1374_v30 = vsel %vm1363_vm13, %v1369_v29, %v1373_v36  ;;  %v846_v50 = vpop.permute.xlu1 %845 }
 0x1ee   : > { %2003 = vmatpush3.bf16.msra.mxu0 %v1178_v31  ;;  %1999 = vmatmul.mubr.msk.bf16.vlgmr.msra.gmra.mrb[16].mxu1 %vm652_vm7, %v1071_v21  ;;  %v841_v51 = vpop.permute.xlu0 %840 }
 0x1ef   : > { %2004 = vmatprep.mubr.msk.bf16.mxu0 %vm652_vm7, %v1168_v11  ;;  %2009 = vmatpush3.bf16.msra.mxu1 %v1277_v38 }
 0x1f0   : > { %2010 = vmatprep.mubr.msk.bf16.mxu1 %vm652_vm7, %v1267_v15  ;;  %2057 = vmatprep.subr.msk.bf16.mxu0 %vm659_vm3, %v1864_v33 }
 0x1f1   : > { %2058 = vmatprep.subr.msk.bf16.mxu1 %vm659_vm3, %v1871_v35  ;;  %v937_v52 = vpop.permute.xlu1 %936 }
 0x1f2   : > { %v932_v53 = vpop.permute.xlu0 %931 }
 0x1f5   : > { %2005 = vmatmul.mubr.msk.bf16.vlgmr.msra.gmra.mrb[12].mxu0 %vm652_vm7, %v1170_v17  ;;  %v947_v54 = vpop.permute.xlu1 %946 }
 0x1f6   : > { %2015 = vmatpush3.bf16.msra.mxu0 %v1382_v39  ;;  %2011 = vmatmul.mubr.msk.bf16.vlgmr.msra.gmra.mrb[20].mxu1 %vm652_vm7, %v1269_v18  ;;  %v942_v55 = vpop.permute.xlu0 %941 }
 0x1f7   : > { %2016 = vmatprep.mubr.msk.bf16.mxu0 %vm652_vm7, %v1370_v34  ;;  %2021 = vmatpush3.bf16.msra.mxu1 %v1480_v40 }
 0x1f8   : > { %2022 = vmatprep.mubr.msk.bf16.mxu1 %vm652_vm7, %v1470_v32  ;;  %2059 = vmatprep.subr.msk.bf16.mxu0 %vm659_vm3, %v1581_v41 }
 0x1f9   : > { %v2446_v56 = vpop.permute.xlu1 %1035 }
 0x1fa   : > { %v1031_v57 = vpop.permute.xlu0 %1030 }
 0x1fd   : > { %2017 = vmatmul.mubr.msk.bf16.vlgmr.msra.gmra.mrb[16].mxu0 %vm652_vm7, %v1374_v30  ;;  %v1046_v58 = vpop.permute.xlu1 %1045 }
 0x1fe   : > { %2023 = vmatmul.mubr.msk.bf16.vlgmr.msra.gmra.mrb[24].mxu1 %vm652_vm7, %v1472_v37  ;;  %2027 = vmatpush3.bf16.msra.mxu0 %v1596_v42  ;;  %v1041_v59 = vpop.permute.xlu0 %1040 }
 0x1ff   : > { %2032 = vmatprep.subr.bf16.mxu0 %v2443_v43 }
 0x201   : > { %v2448_v60 = vpop.permute.xlu1 %1142 }
 0x202   : > { %v1138_v61 = vpop.permute.xlu0 %1137 }
 0x205   : > { %v1153_v62 = vpop.permute.xlu1 %1152 }
 0x206   : > { %v1148_v63 = vpop.permute.xlu0 %1147 }
 0x209   : > { %v2450_v0 = vpop.permute.xlu1 %1241 }
 0x20a   : > { %v2452_v1 = vpop.permute.xlu0 %1236 }
 0x20d   : > { %v2454_v2 = vpop.permute.xlu1 %1251 }
 0x20e   : > { %v2456_v3 = vpop.permute.xlu0 %1246 }
 0x211   : > { %v2458_v4 = vpop.permute.xlu1 %1340 }
 0x212   : > { %v2460_v5 = vpop.permute.xlu0 %1335 }
 0x215   : > { %v2462_v6 = vpop.permute.xlu1 %1350 }
 0x216   : > { %v2464_v8 = vpop.permute.xlu0 %1345 }
 0x219   : > { %v2466_v12 = vpop.permute.xlu1 %1445 }
 0x21a   : > { %v2468_v13 = vpop.permute.xlu0 %1440 }
 0x21d   : > { %v2470_v42 = vpop.permute.xlu1 %1455 }
 0x2b1   : > { %v1976_v7 = vpop.f32.mrb[8].mxu1 }
 0x2b2   : > { %v697_v9 = vpop.f32.mrb[9].mxu1  ;;  %v738_v15 = vmul.f32 %v1976_v7, %v729_v49 }
 0x2b3   : > { %v1977_v10 = vpop.f32.mrb[10].mxu1  ;;  %v736_v21 = vmul.f32 %v719_v45, %v697_v9  ;;  %v1451_v45 = vpop.permute.xlu0 %1450 }
 0x2b4   : > { %v700_v11 = vpop.f32.mrb[11].mxu1  ;;  %v739_v26 = vmul.f32 %v1977_v10, %v734_v48 }
 0x2b5   : > { %v737_v36 = vmul.f32 %v724_v47, %v700_v11 }
 0x2b8   : > { %v1982_v14 = vpop.f32.mrb[4].mxu0 }
 0x2b9   : > { %v850_v17 = vmul.f32 %v1982_v14, %v841_v51  ;;  %v808_v18 = vpop.f32.mrb[5].mxu0  ;;  %v1988_v20 = vpop.f32.mrb[12].mxu1 }
 0x2ba   : > { %v848_v22 = vmul.f32 %v831_v44, %v808_v18  ;;  %v951_v23 = vmul.f32 %v1988_v20, %v942_v55  ;;  %v1983_v24 = vpop.f32.mrb[6].mxu0  ;;  %v909_v25 = vpop.f32.mrb[13].mxu1 }
 0x2bb   : > { %v854_v27 = vadd.f32 %v850_v17, %v738_v15  ;;  %v851_v28 = vmul.f32 %v1983_v24, %v846_v50  ;;  %v949_v29 = vmul.f32 %v932_v53, %v909_v25  ;;  %v811_v31 = vpop.f32.mrb[7].mxu0  ;;  %v1989_v32 = vpop.f32.mrb[14].mxu1 }
 0x2bc   : > { %v852_v37 = vadd.f32 %v848_v22, %v736_v21  ;;  %v849_v38 = vmul.f32 %v836_v46, %v811_v31  ;;  %v952_v34 = vmul.f32 %v1989_v32, %v947_v54  ;;  %v912_v33 = vpop.f32.mrb[15].mxu1  ;;  %v1539_v24 = vpop.permute.xlu0 %1538 }
 0x2bd   : > { %v955_v30 = vadd.f32 %v951_v23, %v854_v27  ;;  %v855_v35 = vadd.f32 %v851_v28, %v739_v26  ;;  %v950_v39 = vmul.f32 %v937_v52, %v912_v33 }
 0x2be   : > { %v953_v40 = vadd.f32 %v949_v29, %v852_v37  ;;  %v853_v41 = vadd.f32 %v849_v38, %v737_v36 }
 0x2bf   : > { %v956_v44 = vadd.f32 %v952_v34, %v855_v35 }
 0x2c0   : > { %v954_v48 = vadd.f32 %v950_v39, %v853_v41  ;;  %v1994_v49 = vpop.f32.mrb[8].mxu0 }
 0x2c1   : > { %v1050_v50 = vmul.f32 %v1994_v49, %v1041_v59  ;;  %v1008_v51 = vpop.f32.mrb[9].mxu0  ;;  %v2000_v53 = vpop.f32.mrb[16].mxu1 }
 0x2c2   : > { %v1048_v55 = vmul.f32 %v1031_v57, %v1008_v51  ;;  %v1157_v47 = vmul.f32 %v2000_v53, %v1148_v63  ;;  %v1995_v7 = vpop.f32.mrb[10].mxu0  ;;  %v1115_v46 = vpop.f32.mrb[17].mxu1 }
 0x2c3   : > { %v1054_v54 = vadd.f32 %v1050_v50, %v955_v30  ;;  %v1051_v9 = vmul.f32 %v1995_v7, %v1046_v58  ;;  %v1155_v10 = vmul.f32 %v1138_v61, %v1115_v46  ;;  %v1011_v11 = vpop.f32.mrb[11].mxu0  ;;  %v2001_v52 = vpop.f32.mrb[18].mxu1 }
 0x2c4   : > { %v1052_v14 = vadd.f32 %v1048_v55, %v953_v40  ;;  %v1049_v15 = vmul.f32 %v2446_v56, %v1011_v11  ;;  %v1158_v17 = vmul.f32 %v2001_v52, %v1153_v62  ;;  %v1118_v18 = vpop.f32.mrb[19].mxu1  ;;  %v1544_v57 = vpop.permute.xlu1 %1543 }
 0x2c5   : > { %v1161_v20 = vadd.f32 %v1157_v47, %v1054_v54  ;;  %v1055_v21 = vadd.f32 %v1051_v9, %v956_v44  ;;  %v1156_v59 = vmul.f32 %v2448_v60, %v1118_v18  ;;  %v1549_v44 = vpop.permute.xlu0 %1548  ;;  %v1878_v9 = vld [vmem:[%s2515_s6] ss:$0 sm:$0xff] }
 0x2c6   : > { %v1159_v22 = vadd.f32 %v1155_v10, %v1052_v14  ;;  %v1053_v23 = vadd.f32 %v1049_v15, %v954_v48 }
 0x2c7   : > { %v1162_v63 = vadd.f32 %v1158_v17, %v1055_v21 }
 0x2c8   : > { %v1160_v25 = vadd.f32 %v1156_v59, %v1053_v23  ;;  %v2006_v26 = vpop.f32.mrb[12].mxu0  ;;  %v1554_v40 = vpop.permute.xlu1 %1553 }
 0x2c9   : > { %v1256_v58 = vmul.f32 %v2006_v26, %v2456_v3  ;;  %v1214_v61 = vpop.f32.mrb[13].mxu0  ;;  %v2012_v27 = vpop.f32.mrb[20].mxu1 }
 0x2ca   : > { %v1254_v28 = vmul.f32 %v2452_v1, %v1214_v61  ;;  %v1355_v56 = vmul.f32 %v2012_v27, %v2464_v8  ;;  %v2007_v62 = vpop.f32.mrb[14].mxu0  ;;  %v1313_v29 = vpop.f32.mrb[21].mxu1 }
 0x2cb   : > { %v1260_v31 = vadd.f32 %v1256_v58, %v1161_v20  ;;  %v1257_v60 = vmul.f32 %v2007_v62, %v2454_v2  ;;  %v1353_v32 = vmul.f32 %v2460_v5, %v1313_v29  ;;  %v1217_v36 = vpop.f32.mrb[15].mxu0  ;;  %v2013_v37 = vpop.f32.mrb[22].mxu1  ;;  %v1882_v58 = vld [vmem:[%s2519_s10] ss:$0 sm:$0xff] }
 0x2cc   : > { %v1258_v38 = vadd.f32 %v1254_v28, %v1159_v22  ;;  %v1255_v34 = vmul.f32 %v2450_v0, %v1217_v36  ;;  %v1356_v3 = vmul.f32 %v2013_v37, %v2462_v6  ;;  %v1316_v33 = vpop.f32.mrb[23].mxu1 }
 0x2cd   : > { %v1359_v30 = vadd.f32 %v1355_v56, %v1260_v31  ;;  %v1261_v35 = vadd.f32 %v1257_v60, %v1162_v63  ;;  %v1354_v1 = vmul.f32 %v2458_v4, %v1316_v33 }
 0x2ce   : > { %v1357_v8 = vadd.f32 %v1353_v32, %v1258_v38  ;;  %v1259_v39 = vadd.f32 %v1255_v34, %v1160_v25 }
 0x2cf   : > { %v1360_v41 = vadd.f32 %v1356_v3, %v1261_v35 }
 0x2d0   : > { %v1358_v2 = vadd.f32 %v1354_v1, %v1259_v39  ;;  %v2018_v48 = vpop.f32.mrb[16].mxu0 }
 0x2d1   : > { %v1460_v5 = vmul.f32 %v2018_v48, %v1451_v45  ;;  %v1418_v49 = vpop.f32.mrb[17].mxu0  ;;  %v2024_v50 = vpop.f32.mrb[24].mxu1 }
 0x2d2   : > { %v1458_v51 = vmul.f32 %v2468_v13, %v1418_v49  ;;  %v1558_v0 = vmul.f32 %v2024_v50, %v1549_v44  ;;  %v2019_v53 = vpop.f32.mrb[18].mxu0  ;;  %v1516_v6 = vpop.f32.mrb[25].mxu1 }
 0x2d3   : > { %v1464_v55 = vadd.f32 %v1460_v5, %v1359_v30  ;;  %v1461_v47 = vmul.f32 %v2019_v53, %v2470_v42  ;;  %v1556_v7 = vmul.f32 %v1539_v24, %v1516_v6  ;;  %v1421_v4 = vpop.f32.mrb[19].mxu0  ;;  %v2025_v46 = vpop.f32.mrb[26].mxu1 }
 0x2d4   : > { %v1462_v54 = vadd.f32 %v1458_v51, %v1357_v8  ;;  %v1459_v45 = vmul.f32 %v2466_v12, %v1421_v4  ;;  %v1559_v10 = vmul.f32 %v2025_v46, %v1554_v40  ;;  %v1519_v11 = vpop.f32.mrb[27].mxu1 }
 0x2d5   : > { %v1562_v52 = vadd.f32 %v1558_v0, %v1464_v55  ;;  %v1465_v13 = vadd.f32 %v1461_v47, %v1360_v41  ;;  %v1557_v14 = vmul.f32 %v1544_v57, %v1519_v11  ;;  %v1879_v57 = vld [vmem:[%s2517_s8] ss:$0 sm:$0xff] }
 0x2d6   : > { %v1560_v15 = vadd.f32 %v1556_v7, %v1462_v54  ;;  %v1463_v17 = vadd.f32 %v1459_v45, %v1358_v2  ;;  %v2044_v61 = vadd.f32 %v1882_v58, %v1879_v57 }
 0x2d7   : > { %v1573_v18 = vadd.f32 %v1878_v9, %v1562_v52  ;;  %v1563_v20 = vadd.f32 %v1559_v10, %v1465_v13 }
 0x2d8   : > { %v1571_v42 = vadd.f32 %v1878_v9, %v1560_v15  ;;  %v1561_v21 = vadd.f32 %v1557_v14, %v1463_v17 }
 0x2d9   : > { %v1574_v59 = vadd.f32 %v1878_v9, %v1563_v20  ;;  %v1577_v23 = vmax.f32 %v1573_v18, 0.0 }
 0x2da   : > { %v1572_v22 = vadd.f32 %v1878_v9, %v1561_v21  ;;  %v1575_v24 = vmax.f32 %v1571_v42, 0.0 }
 0x2db   : > { %v1578_v63 = vmax.f32 %v1574_v59, 0.0 }
 0x2dc   : > { %v1576_v25 = vmax.f32 %v1572_v22, 0.0 }
 0x2dd   : > { %v1580_v26 = vpack.c.bf16 %v1578_v63, %v1577_v23 }
 0x2de   : > { %v1579_v12 = vpack.c.bf16 %v1576_v25, %v1575_v24 }
 0x2e0   : > { %2028 = vmatprep.mubr.msk.bf16.mxu0 %vm652_vm7, %v1579_v12 }
 0x2e1   : > { %2029 = vmatmul.mubr.msk.bf16.vlgmr.msra.gmra.mrb[20].mxu0 %vm652_vm7, %v1580_v26 }
 0x2e2   : > { %2033 = vmatpush3.bf16.msra.mxu0 %v2443_v43  ;;  %2034 = vmatprep.mubr.msk.bf16.mxu0 %vm565_vm2, %v2174_v16 }
 0x2ed   : > { %2035 = vmatmul.mubr.msk.bf16.vlgmr.msra.gmra.mrb[20].mxu0 %vm565_vm2, %v2176_v19 }
 0x3c0   : > { %v2036_v27 = vpop.f32.mrb[20].mxu0 }
 0x3c1   : > { %v2038_v43 = vadd.f32 %v2036_v27, %v1879_v57  ;;  %v1696_v28 = vpop.f32.mrb[21].mxu0 }
 0x3c2   : > { %v2040_v16 = vadd.f32 %v1879_v57, %v1696_v28  ;;  %v2037_v56 = vpop.f32.mrb[22].mxu0 }
 0x3c3   : > { %v2039_v62 = vadd.f32 %v2038_v43, %v1882_v58  ;;  %v2043_v19 = vadd.f32 %v2044_v61, %v2037_v56  ;;  %v1699_v29 = vpop.f32.mrb[23].mxu0 }
 0x3c4   : > { %v2041_v31 = vadd.f32 %v2040_v16, %v1882_v58  ;;  %v2045_v60 = vadd.f32 %v2044_v61, %v1699_v29 }
 0x3c5   : > { %v1717_v32 = vmax.f32 %v2039_v62, 0.0  ;;  %v1718_v38 = vmax.f32 %v2043_v19, 0.0 }
 0x3c6   : > { %v1715_v36 = vmax.f32 %v2041_v31, 0.0  ;;  %v1716_v37 = vmax.f32 %v2045_v60, 0.0 }
 0x3c7   : > { %v1894_v33 = vpack.c.bf16 %v1717_v32, %v1717_v32  ;;  %v1895_v30 = vpack.c.bf16 %v1718_v38, %v1718_v38 }
 0x3c8   : > { %v1892_v34 = vpack.c.bf16 %v1715_v36, %v1715_v36  ;;  %v1893_v3 = vpack.c.bf16 %v1716_v37, %v1716_v37 }
 0x3c9   : > { %1738 = vst.msk [vmem:[%s388_s12 + $0x8] sm:$0xf] %vm1735_vm14, %v1894_v33  ;;  %1739 = vst.msk [vmem:[%s388_s12 + $0xc] sm:$0xf] %vm1735_vm14, %v1895_v30 }
 0x3ca   : > { %1736 = vst.msk [vmem:[%s388_s12] sm:$0xf] %vm1735_vm14, %v1892_v34  ;;  %1737 = vst.msk [vmem:[%s388_s12 + $0x4] sm:$0xf] %vm1735_vm14, %v1893_v3 }
 0x3cb PF: > { %s21_s17 = sadd.s32 1, %s2090_s17  }
 0x3cc   : > { %p18_p5 = scmp.ge.s32.totalorder %s21_s17, 4  }
 0x3ce   :  { %20 = sbr.rel (!%p18_p5) target bundleno = 1 (0x1), region = 110 }

</bundles_post_ra>
